<compile_context>
chip_gen: v6e
topology: v6e:2x2x1
jax: 0.10.0
libtpu: 0.0.40
codegen_flags: <defaults>
</compile_context>

<pallas_src>
import math

import jax
import jax.numpy as jnp
from jax import lax
from jax.experimental import pallas as pl
from jax.experimental.pallas import tpu as pltpu

# ---------------- small config (consistent with what the forward implies) ----
B = 2              # batch
C_IN = 3           # image channels
IMG = 16           # image spatial size
PATCH = 4          # encoder downsample factor ("conv" kernel == stride == 4)
LAT_H = IMG // PATCH
LAT_W = IMG // PATCH
N_TOK = LAT_H * LAT_W          # 16 codebook indices per image
EMB_DIM = 32                   # codebook / latent dim (256 in the real VQGAN)
VOCAB = 64                     # args.num_codebook_vectors
VOCAB_PAD = 128                # lane-dense logits; sliced back to VOCAB in the wrapper
N_EMBD = 32                    # GPT n_embd   (1024 in the real config)
N_HEAD = 4                     # GPT n_head   (16   in the real config)
HEAD_DIM = N_EMBD // N_HEAD
N_LAYER = 2                    # GPT n_layer  (24   in the real config)
BLOCK_SIZE = 32                # GPT block_size (512 in the real config)
SOS_TOKEN = 0
PKEEP = 0.5

_VMEM = pl.BlockSpec(memory_space=pltpu.MemorySpace.VMEM)
# Explicit scoped-VMEM budget.  Toy shapes need far less; at the real config raise this on
# v5e/v6e (128 MiB physical) and keep <=~56 MiB on v7x (64 MiB physical) while tiling BT.
_VMEM_LIMIT = 32 * 1024 * 1024


# ----------------------------- Pallas kernels --------------------------------
def _encode_vq_kernel(p_ref, w_ref, b_ref, cbt_ref, cbn_ref, idx_ref):
    """Fused VQGAN encoder patchify-matmul + nearest-codebook argmin.

    z = patches @ W + b stays in VMEM.  The codebook arrives pre-transposed as (D, K) so the
    distance term is one plain (N, D) @ (D, K) MXU dot (no einsum relayout).  The per-row
    ||z||^2 term is dropped (constant w.r.t. the argmin over k).
    """
    z = (jnp.dot(p_ref[...], w_ref[...], preferred_element_type=jnp.float32)
         + b_ref[...])                                            # (N, D) f32
    # score[n, k] = ||c_k||^2 - 2 * z_n . c_k   (argmin_k identical to full L2)
    score = cbn_ref[...] - 2.0 * jnp.dot(z, cbt_ref[...],
                                         preferred_element_type=jnp.float32)   # (N, K)
    k = score.shape[1]
    smin = jnp.min(score, axis=1, keepdims=True)                  # (N, 1)
    iota = lax.broadcasted_iota(jnp.int32, score.shape, 1)        # (N, K)
    # first index on ties, matching torch argmin
    idx_ref[...] = jnp.min(jnp.where(score <= smin, iota, k), axis=1, keepdims=True)


def _gpt_kernel(x_ref,
                g1_ref, b1_ref, wqkv_ref, bqkv_ref,
                wproj_ref, bproj_ref, g2_ref, b2_ref,
                wfc_ref, bfc_ref, wfc2_ref, bfc2_ref,
                gf_ref, bf_ref, whead_ref,
                o_ref, x_sc):
    """One fused GPT.  Grid = (batch_tile, layer); one sequence per batch tile.

    The residual stream for the current batch tile lives in the VMEM scratch x_sc and is
    carried across the (inner, "arbitrary") layer axis.  The final LayerNorm + bias-free
    logits head run on the last layer step under pl.when.
    """
    l = pl.program_id(1)
    n_layer = pl.num_programs(1)

    @pl.when(l == 0)
    def _():
        x_sc[...] = x_ref[...]          # load token+pos embeddings for this sequence

    def layer_norm(v, g, b):            # f32 elementwise math (v5e-friendly)
        mu = jnp.mean(v, axis=-1, keepdims=True)
        var = jnp.mean((v - mu) ** 2, axis=-1, keepdims=True)
        return (v - mu) * lax.rsqrt(var + 1e-5) * g + b

    x = x_sc[...]                                   # (T, D) f32
    t = x.shape[0]

    # ----------------------- attention -----------------------
    h1 = layer_norm(x, g1_ref[0], b1_ref[0])
    h1b = h1.astype(jnp.bfloat16)

    # Fused QKV: one lane-dense (T, D) @ (D, 3D) MXU dot (softmax scale folded into wq).
    qkv = (jnp.dot(h1b, wqkv_ref[0], preferred_element_type=jnp.float32)
           + bqkv_ref[0])                           # (T, 3D) f32

    # Causal mask generated in-kernel (one sequence per tile => plain causal); kept in f32
    # so -1e30 never becomes -inf.
    row = lax.broadcasted_iota(jnp.int32, (t, t), 0)
    col = lax.broadcasted_iota(jnp.int32, (t, t), 1)
    neg = jnp.where(col <= row, 0.0, -1e30).astype(jnp.float32)

    # Per-head scores/softmax/AV on small slices; head outputs concatenated so the output
    # projection is one full-width (T, D) @ (D, D) dot.  N_HEAD is tiny here; at real config
    # restructure to a head-batched contraction or lax.fori_loop(unroll=True).
    ys = []
    for h in range(N_HEAD):
        lo = h * HEAD_DIM
        qh = qkv[:, lo:lo + HEAD_DIM]                                   # (T, hd)
        kh = qkv[:, N_EMBD + lo:N_EMBD + lo + HEAD_DIM]
        vh = qkv[:, 2 * N_EMBD + lo:2 * N_EMBD + lo + HEAD_DIM]
        s = jnp.einsum('qd,kd->qk', qh.astype(jnp.bfloat16), kh.astype(jnp.bfloat16),
                       preferred_element_type=jnp.float32) + neg        # (T, T) f32
        s = s - jnp.max(s, axis=-1, keepdims=True)
        p = jnp.exp(s)
        p = p * pl.reciprocal(jnp.sum(p, axis=-1, keepdims=True), approx=True)
        ys.append(jnp.dot(p.astype(jnp.bfloat16), vh.astype(jnp.bfloat16),
                          preferred_element_type=jnp.float32))          # (T, hd)
    y = jnp.concatenate(ys, axis=-1).astype(jnp.bfloat16)               # (T, D)
    x = x + (jnp.dot(y, wproj_ref[0], preferred_element_type=jnp.float32)
             + bproj_ref[0])

    # ----------------------- MLP ------------------------------
    h2 = layer_norm(x, g2_ref[0], b2_ref[0])
    f = (jnp.dot(h2.astype(jnp.bfloat16), wfc_ref[0], preferred_element_type=jnp.float32)
         + bfc_ref[0])                                                  # (T, 4D) f32
    # TODO(synk): PyTorch nn.GELU defaults to exact erf; tanh approximation used here.
    f = 0.5 * f * (1.0 + jnp.tanh(0.7978845608028654 * (f + 0.044715 * f * f * f)))
    f2 = (jnp.dot(f.astype(jnp.bfloat16), wfc2_ref[0], preferred_element_type=jnp.float32)
          + bfc2_ref[0])
    x = x + f2
    x_sc[...] = x

    # ------------- final LN + logits head (last layer only) ---
    @pl.when(l == n_layer - 1)
    def _():
        hf = layer_norm(x, gf_ref[...], bf_ref[...])
        o_ref[...] = jnp.dot(hf.astype(jnp.bfloat16), whead_ref[...],
                             preferred_element_type=jnp.float32)        # (T, VOCAB_PAD)


# ----------------------------- parameters ------------------------------------
def init_params(key):
    ks = jax.random.split(key, 12)
    L, D, H, hd = N_LAYER, N_EMBD, N_HEAD, HEAD_DIM

    def nrm(k, shape):
        return 0.02 * jax.random.normal(k, shape, jnp.float32)

    p = {}
    # synthetic VQGAN encoder (patchify conv) + codebook (pre-transposed, precomputed norms)
    p['enc_w'] = nrm(ks[0], (C_IN * PATCH * PATCH, EMB_DIM))
    p['enc_b'] = jnp.zeros((1, EMB_DIM), jnp.float32)
    codebook = jax.random.normal(ks[1], (VOCAB, EMB_DIM), jnp.float32)
    p['codebook_t'] = jnp.transpose(codebook)                              # (D, K)
    p['cb_norm'] = jnp.sum(codebook * codebook, axis=-1)[None, :]          # (1, K)

    # GPT embeddings
    p['wte'] = nrm(ks[2], (VOCAB, N_EMBD))
    p['wpe'] = nrm(ks[3], (BLOCK_SIZE, N_EMBD))

    # GPT blocks: weights stacked over layers; QKV fused into one (D, 3D) matrix with the
    # 1/sqrt(head_dim) softmax scale folded into the q columns; bf16 matmul weights.
    scale = 1.0 / math.sqrt(hd)
    p['g1'] = jnp.ones((L, 1, D), jnp.float32)
    p['b1'] = jnp.zeros((L, 1, D), jnp.float32)
    wq = nrm(ks[4], (L, D, D)) * scale
    wk = nrm(ks[5], (L, D, D))
    wv = nrm(ks[6], (L, D, D))
    p['wqkv'] = jnp.concatenate([wq, wk, wv], axis=-1).astype(jnp.bfloat16)   # (L, D, 3D)
    p['bqkv'] = jnp.zeros((L, 1, 3 * D), jnp.float32)   # q-bias slots are pre-scaled (zero here)
    p['wproj'] = nrm(ks[7], (L, D, D)).astype(jnp.bfloat16)                   # full-width proj
    p['bproj'] = jnp.zeros((L, 1, D), jnp.float32)
    p['g2'] = jnp.ones((L, 1, D), jnp.float32)
    p['b2'] = jnp.zeros((L, 1, D), jnp.float32)
    p['wfc'] = nrm(ks[8], (L, D, 4 * D)).astype(jnp.bfloat16)
    p['bfc'] = jnp.zeros((L, 1, 4 * D), jnp.float32)
    p['wfc2'] = nrm(ks[9], (L, 4 * D, D)).astype(jnp.bfloat16)
    p['bfc2'] = jnp.zeros((L, 1, D), jnp.float32)

    # final LN + head (bias-free, like minGPT); padded to 128 lanes, sliced in wrapper
    p['gf'] = jnp.ones((1, D), jnp.float32)
    p['bf'] = jnp.zeros((1, D), jnp.float32)
    whead = nrm(ks[10], (D, VOCAB))
    p['whead'] = jnp.pad(whead, ((0, 0), (0, VOCAB_PAD - VOCAB))).astype(jnp.bfloat16)
    return p


# ----------------------------- model pieces ----------------------------------
def encode_to_z(params, x):
    """Synthetic VQGAN.encode: fused patchify-matmul + VQ argmin (single Pallas kernel)."""
    b = x.shape[0]
    # NCHW -> (B*h*w, C*p*p) patches (pure layout glue in XLA)
    patches = x.reshape(b, C_IN, LAT_H, PATCH, LAT_W, PATCH)
    patches = jnp.transpose(patches, (0, 2, 4, 1, 3, 5)).reshape(
        b * N_TOK, C_IN * PATCH * PATCH)
    idx_col = pl.pallas_call(
        _encode_vq_kernel,
        out_shape=jax.ShapeDtypeStruct((b * N_TOK, 1), jnp.int32),
        in_specs=[_VMEM] * 5,
        out_specs=_VMEM,
        compiler_params=pltpu.CompilerParams(vmem_limit_bytes=_VMEM_LIMIT),
    )(patches, params['enc_w'], params['enc_b'], params['codebook_t'], params['cb_norm'])
    indices = idx_col.reshape(b, N_TOK)          # indices.view(quant_z.shape[0], -1)
    return indices


def gpt_forward(params, tokens):
    b, t = tokens.shape
    d, vp = N_EMBD, VOCAB_PAD

    # TODO(synk): minGPT dropout layers are skipped (eval/deterministic semantics).
    # TODO(synk): token/pos embedding gather kept in XLA glue; could be fused into the GPT
    # kernel via scalar-prefetched token ids at real scale.
    tok_emb = jnp.take(params['wte'], tokens, axis=0)            # embedding lookup (glue)
    pos_emb = params['wpe'][:t][None, :, :]
    x = (tok_emb + pos_emb).astype(jnp.float32).reshape(b * t, d)   # 2-D residual stream

    args = (x,
            params['g1'], params['b1'], params['wqkv'], params['bqkv'],
            params['wproj'], params['bproj'], params['g2'], params['b2'],
            params['wfc'], params['bfc'], params['wfc2'], params['bfc2'],
            params['gf'], params['bf'], params['whead'])

    in_specs = [
        pl.BlockSpec((t, d), lambda i, l: (i, 0)),                    # x (one sequence / tile)
        pl.BlockSpec((1, 1, d), lambda i, l: (l, 0, 0)),              # g1
        pl.BlockSpec((1, 1, d), lambda i, l: (l, 0, 0)),              # b1
        pl.BlockSpec((1, d, 3 * d), lambda i, l: (l, 0, 0)),          # wqkv (fused)
        pl.BlockSpec((1, 1, 3 * d), lambda i, l: (l, 0, 0)),          # bqkv
        pl.BlockSpec((1, d, d), lambda i, l: (l, 0, 0)),              # wproj (full-width)
        pl.BlockSpec((1, 1, d), lambda i, l: (l, 0, 0)),              # bproj
        pl.BlockSpec((1, 1, d), lambda i, l: (l, 0, 0)),              # g2
        pl.BlockSpec((1, 1, d), lambda i, l: (l, 0, 0)),              # b2
        pl.BlockSpec((1, d, 4 * d), lambda i, l: (l, 0, 0)),          # wfc
        pl.BlockSpec((1, 1, 4 * d), lambda i, l: (l, 0, 0)),          # bfc
        pl.BlockSpec((1, 4 * d, d), lambda i, l: (l, 0, 0)),          # wfc2
        pl.BlockSpec((1, 1, d), lambda i, l: (l, 0, 0)),              # bfc2
        pl.BlockSpec((1, d), lambda i, l: (0, 0)),                    # gf
        pl.BlockSpec((1, d), lambda i, l: (0, 0)),                    # bf
        pl.BlockSpec((d, vp), lambda i, l: (0, 0)),                   # whead (padded)
    ]

    flops_layer = (2 * t * d * 3 * d         # fused qkv
                   + 4 * t * t * d           # scores + att@v (all heads)
                   + 2 * t * d * d           # out proj
                   + 16 * t * d * d)         # mlp
    flops = b * (N_LAYER * flops_layer + 2 * t * d * vp)
    transcendentals = b * N_LAYER * (N_HEAD * t * t + t * 4 * d)
    bytes_accessed = sum(int(a.size) * a.dtype.itemsize for a in args) + b * t * vp * 4
    cost = pl.CostEstimate(flops=int(flops), transcendentals=int(transcendentals),
                           bytes_accessed=int(bytes_accessed))

    logits_pad = pl.pallas_call(
        _gpt_kernel,
        out_shape=jax.ShapeDtypeStruct((b * t, vp), jnp.float32),
        grid_spec=pltpu.PrefetchScalarGridSpec(
            num_scalar_prefetch=0,
            grid=(b, N_LAYER),                       # (batch tile, layer) — layer innermost
            in_specs=in_specs,
            out_specs=pl.BlockSpec((t, vp), lambda i, l: (i, 0)),
            scratch_shapes=[pltpu.VMEM((t, d), jnp.float32)],   # per-tile residual stream
        ),
        compiler_params=pltpu.CompilerParams(
            dimension_semantics=("parallel", "arbitrary"),      # batch across TCs on v7x
            vmem_limit_bytes=_VMEM_LIMIT),
        cost_estimate=cost,
    )(*args)

    logits = logits_pad[:, :VOCAB].reshape(b, t, VOCAB)
    return logits, None


def vqgan_transformer_forward(params, x, key):
    """Mirrors VQGANTransformer.forward(x) -> (logits, target)."""
    indices = encode_to_z(params, x)
    b = x.shape[0]
    # int32 used instead of torch int64 (JAX default has x64 disabled)
    sos_tokens = (jnp.ones((b, 1), jnp.float32) * SOS_TOKEN).astype(jnp.int32)
    k_mask, k_rand = jax.random.split(key)
    mask = jax.random.bernoulli(k_mask, PKEEP, indices.shape).astype(jnp.int32)
    random_indices = jax.random.randint(k_rand, indices.shape, 0, VOCAB, dtype=jnp.int32)
    new_indices = mask * indices + (1 - mask) * random_indices
    new_indices = jnp.concatenate([sos_tokens, new_indices], axis=1)
    target = indices
    logits, _ = gpt_forward(params, new_indices[:, :-1])
    return logits, target


# --------------------------------- main ---------------------------------------
if __name__ == "__main__":
    key = jax.random.PRNGKey(0)
    k_x, k_p, k_fwd = jax.random.split(key, 3)
    x = jax.random.normal(k_x, (B, C_IN, IMG, IMG), jnp.float32)   # NCHW like PyTorch
    params = init_params(k_p)

    fwd = jax.jit(vqgan_transformer_forward)
    logits, target = fwd(params, x, k_fwd)
    jax.block_until_ready((logits, target))

    assert logits.shape == (B, N_TOK, VOCAB), logits.shape
    assert logits.dtype == jnp.float32
    assert target.shape == (B, N_TOK), target.shape
    assert target.dtype == jnp.int32
    print("KERNEL_OK")
</pallas_src>

<mosaic_0001>
module attributes {stable_mosaic.version = 11 : i64} {
  func.func @_encode_vq_kernel(%arg0: memref<32x48xf32, #tpu.memory_space<vmem>>, %arg1: memref<48x32xf32, #tpu.memory_space<vmem>>, %arg2: memref<1x32xf32, #tpu.memory_space<vmem>>, %arg3: memref<32x64xf32, #tpu.memory_space<vmem>>, %arg4: memref<1x64xf32, #tpu.memory_space<vmem>>, %arg5: memref<32x1xi32, #tpu.memory_space<vmem>>) attributes {dimension_semantics = [], scalar_prefetch = 0 : i64, scratch_operands = 0 : i64, tpu.core_type = #tpu.core_type<tc>} {
    %c0 = arith.constant 0 : index
    %c0_0 = arith.constant 0 : index
    %0 = vector.load %arg0[%c0, %c0_0] : memref<32x48xf32, #tpu.memory_space<vmem>>, vector<32x48xf32>
    %c0_1 = arith.constant 0 : index
    %c0_2 = arith.constant 0 : index
    %1 = vector.load %arg1[%c0_1, %c0_2] : memref<48x32xf32, #tpu.memory_space<vmem>>, vector<48x32xf32>
    %cst = arith.constant dense<0.000000e+00> : vector<32x32xf32>
    %2 = tpu.matmul %0, %1, %cst {dimension_numbers = #tpu.dot_dimension_numbers<[1], [0], [0], [1], [0, 0, 1, 1], [], []>} : vector<32x48xf32>, vector<48x32xf32>, vector<32x32xf32> -> vector<32x32xf32>
    %c0_3 = arith.constant 0 : index
    %c0_4 = arith.constant 0 : index
    %3 = vector.load %arg2[%c0_3, %c0_4] : memref<1x32xf32, #tpu.memory_space<vmem>>, vector<1x32xf32>
    %4 = vector.broadcast %3 : vector<1x32xf32> to vector<32x32xf32>
    %5 = arith.addf %2, %4 : vector<32x32xf32>
    %c0_5 = arith.constant 0 : index
    %c0_6 = arith.constant 0 : index
    %6 = vector.load %arg4[%c0_5, %c0_6] : memref<1x64xf32, #tpu.memory_space<vmem>>, vector<1x64xf32>
    %c0_7 = arith.constant 0 : index
    %c0_8 = arith.constant 0 : index
    %7 = vector.load %arg3[%c0_7, %c0_8] : memref<32x64xf32, #tpu.memory_space<vmem>>, vector<32x64xf32>
    %cst_9 = arith.constant dense<0.000000e+00> : vector<32x64xf32>
    %8 = tpu.matmul %5, %7, %cst_9 {dimension_numbers = #tpu.dot_dimension_numbers<[1], [0], [0], [1], [0, 0, 1, 1], [], []>} : vector<32x32xf32>, vector<32x64xf32>, vector<32x64xf32> -> vector<32x64xf32>
    %cst_10 = arith.constant 2.000000e+00 : f32
    %9 = vector.broadcast %cst_10 : f32 to vector<32x64xf32>
    %10 = arith.mulf %9, %8 : vector<32x64xf32>
    %11 = vector.broadcast %6 : vector<1x64xf32> to vector<32x64xf32>
    %12 = arith.subf %11, %10 : vector<32x64xf32>
    %cst_11 = arith.constant dense<0x7F800000> : vector<32xf32>
    %13 = vector.multi_reduction <minimumf>, %12, %cst_11 [1] : vector<32x64xf32> to vector<32xf32>
    %14 = vector.shape_cast %13 : vector<32xf32> to vector<32x1xf32>
    %15 = tpu.iota {dimensions = array<i32: 1>} : vector<32x64xi32>
    %16 = vector.broadcast %14 : vector<32x1xf32> to vector<32x64xf32>
    %17 = arith.cmpf ole, %12, %16 : vector<32x64xf32>
    %c64_i32 = arith.constant 64 : i32
    %18 = vector.broadcast %c64_i32 : i32 to vector<32x64xi32>
    %19 = arith.select %17, %15, %18 : vector<32x64xi1>, vector<32x64xi32>
    %cst_12 = arith.constant dense<2147483647> : vector<32xi32>
    %20 = vector.multi_reduction <minsi>, %19, %cst_12 [1] : vector<32x64xi32> to vector<32xi32>
    %21 = vector.shape_cast %20 : vector<32xi32> to vector<32x1xi32>
    %c0_13 = arith.constant 0 : index
    %c0_14 = arith.constant 0 : index
    %22 = vector.load %arg5[%c0_13, %c0_14] : memref<32x1xi32, #tpu.memory_space<vmem>>, vector<32x1xi32>
    tpu.vector_store %arg5[%c0_13, %c0_14], %21 {strides = array<i32>} : memref<32x1xi32, #tpu.memory_space<vmem>>, vector<32x1xi32>,
    return
  }
}

module attributes {stable_mosaic.version = 11 : i64} {
  func.func @_gpt_kernel(%arg0: i32, %arg1: i32, %arg2: memref<16x32xf32, #tpu.memory_space<vmem>>, %arg3: memref<1x1x32xf32, #tpu.memory_space<vmem>>, %arg4: memref<1x1x32xf32, #tpu.memory_space<vmem>>, %arg5: memref<1x32x96xbf16, #tpu.memory_space<vmem>>, %arg6: memref<1x1x96xf32, #tpu.memory_space<vmem>>, %arg7: memref<1x32x32xbf16, #tpu.memory_space<vmem>>, %arg8: memref<1x1x32xf32, #tpu.memory_space<vmem>>, %arg9: memref<1x1x32xf32, #tpu.memory_space<vmem>>, %arg10: memref<1x1x32xf32, #tpu.memory_space<vmem>>, %arg11: memref<1x32x128xbf16, #tpu.memory_space<vmem>>, %arg12: memref<1x1x128xf32, #tpu.memory_space<vmem>>, %arg13: memref<1x128x32xbf16, #tpu.memory_space<vmem>>, %arg14: memref<1x1x32xf32, #tpu.memory_space<vmem>>, %arg15: memref<1x32xf32, #tpu.memory_space<vmem>>, %arg16: memref<1x32xf32, #tpu.memory_space<vmem>>, %arg17: memref<32x128xbf16, #tpu.memory_space<vmem>>, %arg18: memref<16x128xf32, #tpu.memory_space<vmem>>, %arg19: memref<16x32xf32, #tpu.memory_space<vmem>>) attributes {dimension_semantics = [#tpu.dimension_semantics<parallel>, #tpu.dimension_semantics<arbitrary>], iteration_bounds = array<i64: 2, 2>, scalar_prefetch = 0 : i64, scratch_operands = 1 : i64, tpu.core_type = #tpu.core_type<tc>, window_params = [{transform_indices = @transform_0, window_bounds = array<i64: 16, 32>}, {transform_indices = @transform_1, window_bounds = array<i64: 1, 1, 32>}, {transform_indices = @transform_2, window_bounds = array<i64: 1, 1, 32>}, {transform_indices = @transform_3, window_bounds = array<i64: 1, 32, 96>}, {transform_indices = @transform_4, window_bounds = array<i64: 1, 1, 96>}, {transform_indices = @transform_5, window_bounds = array<i64: 1, 32, 32>}, {transform_indices = @transform_6, window_bounds = array<i64: 1, 1, 32>}, {transform_indices = @transform_7, window_bounds = array<i64: 1, 1, 32>}, {transform_indices = @transform_8, window_bounds = array<i64: 1, 1, 32>}, {transform_indices = @transform_9, window_bounds = array<i64: 1, 32, 128>}, {transform_indices = @transform_10, window_bounds = array<i64: 1, 1, 128>}, {transform_indices = @transform_11, window_bounds = array<i64: 1, 128, 32>}, {transform_indices = @transform_12, window_bounds = array<i64: 1, 1, 32>}, {pipeline_mode = #tpu.pipeline_mode<synchronous>, transform_indices = @transform_13, window_bounds = array<i64: 1, 32>}, {pipeline_mode = #tpu.pipeline_mode<synchronous>, transform_indices = @transform_14, window_bounds = array<i64: 1, 32>}, {pipeline_mode = #tpu.pipeline_mode<synchronous>, transform_indices = @transform_15, window_bounds = array<i64: 32, 128>}, {transform_indices = @transform_16, window_bounds = array<i64: 16, 128>}]} {
    %c0_i32 = arith.constant 0 : i32
    %0 = arith.cmpi eq, %arg1, %c0_i32 : i32
    %1 = arith.extui %0 : i1 to i32
    %c0_i32_0 = arith.constant 0 : i32
    %2 = arith.cmpi ne, %1, %c0_i32_0 : i32
    scf.if %2 {
      %c0_76 = arith.constant 0 : index
      %c0_77 = arith.constant 0 : index
      %194 = vector.load %arg2[%c0_76, %c0_77] : memref<16x32xf32, #tpu.memory_space<vmem>>, vector<16x32xf32>
      %c0_78 = arith.constant 0 : index
      %c0_79 = arith.constant 0 : index
      %195 = vector.load %arg19[%c0_78, %c0_79] : memref<16x32xf32, #tpu.memory_space<vmem>>, vector<16x32xf32>
      tpu.vector_store %arg19[%c0_78, %c0_79], %194 {strides = array<i32>} : memref<16x32xf32, #tpu.memory_space<vmem>>, vector<16x32xf32>,
    } else {
    }
    %c0 = arith.constant 0 : index
    %c0_1 = arith.constant 0 : index
    %3 = vector.load %arg19[%c0, %c0_1] : memref<16x32xf32, #tpu.memory_space<vmem>>, vector<16x32xf32>
    %c0_2 = arith.constant 0 : index
    %c0_3 = arith.constant 0 : index
    %c0_4 = arith.constant 0 : index
    %4 = vector.load %arg3[%c0_2, %c0_3, %c0_4] : memref<1x1x32xf32, #tpu.memory_space<vmem>>, vector<1x1x32xf32>
    %5 = vector.shape_cast %4 : vector<1x1x32xf32> to vector<1x32xf32>
    %c0_5 = arith.constant 0 : index
    %c0_6 = arith.constant 0 : index
    %c0_7 = arith.constant 0 : index
    %6 = vector.load %arg4[%c0_5, %c0_6, %c0_7] : memref<1x1x32xf32, #tpu.memory_space<vmem>>, vector<1x1x32xf32>
    %7 = vector.shape_cast %6 : vector<1x1x32xf32> to vector<1x32xf32>
    %cst = arith.constant dense<0.000000e+00> : vector<16xf32>
    %8 = vector.multi_reduction <add>, %3, %cst [1] : vector<16x32xf32> to vector<16xf32>
    %9 = vector.shape_cast %8 : vector<16xf32> to vector<16x1xf32>
    %cst_8 = arith.constant 3.200000e+01 : f32
    %10 = vector.broadcast %cst_8 : f32 to vector<16x1xf32>
    %11 = arith.divf %9, %10 : vector<16x1xf32>
    %12 = vector.broadcast %11 : vector<16x1xf32> to vector<16x32xf32>
    %13 = arith.subf %3, %12 : vector<16x32xf32>
    %14 = arith.mulf %13, %13 : vector<16x32xf32>
    %cst_9 = arith.constant dense<0.000000e+00> : vector<16xf32>
    %15 = vector.multi_reduction <add>, %14, %cst_9 [1] : vector<16x32xf32> to vector<16xf32>
    %16 = vector.shape_cast %15 : vector<16xf32> to vector<16x1xf32>
    %cst_10 = arith.constant 3.200000e+01 : f32
    %17 = vector.broadcast %cst_10 : f32 to vector<16x1xf32>
    %18 = arith.divf %16, %17 : vector<16x1xf32>
    %19 = vector.broadcast %11 : vector<16x1xf32> to vector<16x32xf32>
    %20 = arith.subf %3, %19 : vector<16x32xf32>
    %cst_11 = arith.constant 9.99999974E-6 : f32
    %21 = vector.broadcast %cst_11 : f32 to vector<16x1xf32>
    %22 = arith.addf %18, %21 : vector<16x1xf32>
    %23 = math.rsqrt %22 : vector<16x1xf32>
    %24 = vector.broadcast %23 : vector<16x1xf32> to vector<16x32xf32>
    %25 = arith.mulf %20, %24 : vector<16x32xf32>
    %26 = vector.broadcast %5 : vector<1x32xf32> to vector<16x32xf32>
    %27 = arith.mulf %25, %26 : vector<16x32xf32>
    %28 = vector.broadcast %7 : vector<1x32xf32> to vector<16x32xf32>
    %29 = arith.addf %27, %28 : vector<16x32xf32>
    %30 = arith.truncf %29 : vector<16x32xf32> to vector<16x32xbf16>
    %c0_12 = arith.constant 0 : index
    %c0_13 = arith.constant 0 : index
    %c0_14 = arith.constant 0 : index
    %31 = vector.load %arg5[%c0_12, %c0_13, %c0_14] : memref<1x32x96xbf16, #tpu.memory_space<vmem>>, vector<1x32x96xbf16>
    %32 = vector.shape_cast %31 : vector<1x32x96xbf16> to vector<32x96xbf16>
    %cst_15 = arith.constant dense<0.000000e+00> : vector<16x96xf32>
    %33 = tpu.matmul %30, %32, %cst_15 {dimension_numbers = #tpu.dot_dimension_numbers<[1], [0], [0], [1], [0, 0, 1, 1], [], []>} : vector<16x32xbf16>, vector<32x96xbf16>, vector<16x96xf32> -> vector<16x96xf32>
    %c0_16 = arith.constant 0 : index
    %c0_17 = arith.constant 0 : index
    %c0_18 = arith.constant 0 : index
    %34 = vector.load %arg6[%c0_16, %c0_17, %c0_18] : memref<1x1x96xf32, #tpu.memory_space<vmem>>, vector<1x1x96xf32>
    %35 = vector.shape_cast %34 : vector<1x1x96xf32> to vector<1x96xf32>
    %36 = vector.broadcast %35 : vector<1x96xf32> to vector<16x96xf32>
    %37 = arith.addf %33, %36 : vector<16x96xf32>
    %38 = tpu.iota {dimensions = array<i32: 0>} : vector<16x16xi32>
    %39 = tpu.iota {dimensions = array<i32: 1>} : vector<16x16xi32>
    %40 = arith.cmpi sle, %39, %38 : vector<16x16xi32>
    %cst_19 = arith.constant 0.000000e+00 : f32
    %cst_20 = arith.constant -1.000000e+30 : f32
    %41 = vector.broadcast %cst_19 : f32 to vector<16x16xf32>
    %42 = vector.broadcast %cst_20 : f32 to vector<16x16xf32>
    %43 = arith.select %40, %41, %42 : vector<16x16xi1>, vector<16x16xf32>
    %44 = vector.extract_strided_slice %37 {offsets = [0, 0], sizes = [16, 8], strides = [1, 1]} : vector<16x96xf32> to vector<16x8xf32>
    %45 = vector.extract_strided_slice %37 {offsets = [0, 32], sizes = [16, 8], strides = [1, 1]} : vector<16x96xf32> to vector<16x8xf32>
    %46 = vector.extract_strided_slice %37 {offsets = [0, 64], sizes = [16, 8], strides = [1, 1]} : vector<16x96xf32> to vector<16x8xf32>
    %47 = arith.truncf %44 : vector<16x8xf32> to vector<16x8xbf16>
    %48 = arith.truncf %45 : vector<16x8xf32> to vector<16x8xbf16>
    "tpu.trace_start"() <{level = 10 : i32, message = "qd,kd->qk"}> : () -> ()
    %cst_21 = arith.constant dense<0.000000e+00> : vector<16x16xf32>
    %49 = tpu.matmul %47, %48, %cst_21 {dimension_numbers = #tpu.dot_dimension_numbers<[1], [1], [0], [0], [0, 0, 1, 0], [], []>} : vector<16x8xbf16>, vector<16x8xbf16>, vector<16x16xf32> -> vector<16x16xf32>
    "tpu.trace_stop"() : () -> ()
    %50 = arith.addf %49, %43 : vector<16x16xf32>
    %cst_22 = arith.constant dense<0xFF800000> : vector<16xf32>
    %51 = vector.multi_reduction <maximumf>, %50, %cst_22 [1] : vector<16x16xf32> to vector<16xf32>
    %52 = vector.shape_cast %51 : vector<16xf32> to vector<16x1xf32>
    %53 = vector.broadcast %52 : vector<16x1xf32> to vector<16x16xf32>
    %54 = arith.subf %50, %53 : vector<16x16xf32>
    %55 = math.exp %54 : vector<16x16xf32>
    %cst_23 = arith.constant dense<0.000000e+00> : vector<16xf32>
    %56 = vector.multi_reduction <add>, %55, %cst_23 [1] : vector<16x16xf32> to vector<16xf32>
    %57 = vector.shape_cast %56 : vector<16xf32> to vector<16x1xf32>
    %58 = tpu.reciprocal %57 {approx = true} : vector<16x1xf32> -> vector<16x1xf32>
    %59 = vector.broadcast %58 : vector<16x1xf32> to vector<16x16xf32>
    %60 = arith.mulf %55, %59 : vector<16x16xf32>
    %61 = arith.truncf %60 : vector<16x16xf32> to vector<16x16xbf16>
    %62 = arith.truncf %46 : vector<16x8xf32> to vector<16x8xbf16>
    %cst_24 = arith.constant dense<0.000000e+00> : vector<16x8xf32>
    %63 = tpu.matmul %61, %62, %cst_24 {dimension_numbers = #tpu.dot_dimension_numbers<[1], [0], [0], [1], [0, 0, 1, 1], [], []>} : vector<16x16xbf16>, vector<16x8xbf16>, vector<16x8xf32> -> vector<16x8xf32>
    %64 = vector.extract_strided_slice %37 {offsets = [0, 8], sizes = [16, 8], strides = [1, 1]} : vector<16x96xf32> to vector<16x8xf32>
    %65 = vector.extract_strided_slice %37 {offsets = [0, 40], sizes = [16, 8], strides = [1, 1]} : vector<16x96xf32> to vector<16x8xf32>
    %66 = vector.extract_strided_slice %37 {offsets = [0, 72], sizes = [16, 8], strides = [1, 1]} : vector<16x96xf32> to vector<16x8xf32>
    %67 = arith.truncf %64 : vector<16x8xf32> to vector<16x8xbf16>
    %68 = arith.truncf %65 : vector<16x8xf32> to vector<16x8xbf16>
    "tpu.trace_start"() <{level = 10 : i32, message = "qd,kd->qk"}> : () -> ()
    %cst_25 = arith.constant dense<0.000000e+00> : vector<16x16xf32>
    %69 = tpu.matmul %67, %68, %cst_25 {dimension_numbers = #tpu.dot_dimension_numbers<[1], [1], [0], [0], [0, 0, 1, 0], [], []>} : vector<16x8xbf16>, vector<16x8xbf16>, vector<16x16xf32> -> vector<16x16xf32>
    "tpu.trace_stop"() : () -> ()
    %70 = arith.addf %69, %43 : vector<16x16xf32>
    %cst_26 = arith.constant dense<0xFF800000> : vector<16xf32>
    %71 = vector.multi_reduction <maximumf>, %70, %cst_26 [1] : vector<16x16xf32> to vector<16xf32>
    %72 = vector.shape_cast %71 : vector<16xf32> to vector<16x1xf32>
    %73 = vector.broadcast %72 : vector<16x1xf32> to vector<16x16xf32>
    %74 = arith.subf %70, %73 : vector<16x16xf32>
    %75 = math.exp %74 : vector<16x16xf32>
    %cst_27 = arith.constant dense<0.000000e+00> : vector<16xf32>
    %76 = vector.multi_reduction <add>, %75, %cst_27 [1] : vector<16x16xf32> to vector<16xf32>
    %77 = vector.shape_cast %76 : vector<16xf32> to vector<16x1xf32>
    %78 = tpu.reciprocal %77 {approx = true} : vector<16x1xf32> -> vector<16x1xf32>
    %79 = vector.broadcast %78 : vector<16x1xf32> to vector<16x16xf32>
    %80 = arith.mulf %75, %79 : vector<16x16xf32>
    %81 = arith.truncf %80 : vector<16x16xf32> to vector<16x16xbf16>
    %82 = arith.truncf %66 : vector<16x8xf32> to vector<16x8xbf16>
    %cst_28 = arith.constant dense<0.000000e+00> : vector<16x8xf32>
    %83 = tpu.matmul %81, %82, %cst_28 {dimension_numbers = #tpu.dot_dimension_numbers<[1], [0], [0], [1], [0, 0, 1, 1], [], []>} : vector<16x16xbf16>, vector<16x8xbf16>, vector<16x8xf32> -> vector<16x8xf32>
    %84 = vector.extract_strided_slice %37 {offsets = [0, 16], sizes = [16, 8], strides = [1, 1]} : vector<16x96xf32> to vector<16x8xf32>
    %85 = vector.extract_strided_slice %37 {offsets = [0, 48], sizes = [16, 8], strides = [1, 1]} : vector<16x96xf32> to vector<16x8xf32>
    %86 = vector.extract_strided_slice %37 {offsets = [0, 80], sizes = [16, 8], strides = [1, 1]} : vector<16x96xf32> to vector<16x8xf32>
    %87 = arith.truncf %84 : vector<16x8xf32> to vector<16x8xbf16>
    %88 = arith.truncf %85 : vector<16x8xf32> to vector<16x8xbf16>
    "tpu.trace_start"() <{level = 10 : i32, message = "qd,kd->qk"}> : () -> ()
    %cst_29 = arith.constant dense<0.000000e+00> : vector<16x16xf32>
    %89 = tpu.matmul %87, %88, %cst_29 {dimension_numbers = #tpu.dot_dimension_numbers<[1], [1], [0], [0], [0, 0, 1, 0], [], []>} : vector<16x8xbf16>, vector<16x8xbf16>, vector<16x16xf32> -> vector<16x16xf32>
    "tpu.trace_stop"() : () -> ()
    %90 = arith.addf %89, %43 : vector<16x16xf32>
    %cst_30 = arith.constant dense<0xFF800000> : vector<16xf32>
    %91 = vector.multi_reduction <maximumf>, %90, %cst_30 [1] : vector<16x16xf32> to vector<16xf32>
    %92 = vector.shape_cast %91 : vector<16xf32> to vector<16x1xf32>
    %93 = vector.broadcast %92 : vector<16x1xf32> to vector<16x16xf32>
    %94 = arith.subf %90, %93 : vector<16x16xf32>
    %95 = math.exp %94 : vector<16x16xf32>
    %cst_31 = arith.constant dense<0.000000e+00> : vector<16xf32>
    %96 = vector.multi_reduction <add>, %95, %cst_31 [1] : vector<16x16xf32> to vector<16xf32>
    %97 = vector.shape_cast %96 : vector<16xf32> to vector<16x1xf32>
    %98 = tpu.reciprocal %97 {approx = true} : vector<16x1xf32> -> vector<16x1xf32>
    %99 = vector.broadcast %98 : vector<16x1xf32> to vector<16x16xf32>
    %100 = arith.mulf %95, %99 : vector<16x16xf32>
    %101 = arith.truncf %100 : vector<16x16xf32> to vector<16x16xbf16>
    %102 = arith.truncf %86 : vector<16x8xf32> to vector<16x8xbf16>
    %cst_32 = arith.constant dense<0.000000e+00> : vector<16x8xf32>
    %103 = tpu.matmul %101, %102, %cst_32 {dimension_numbers = #tpu.dot_dimension_numbers<[1], [0], [0], [1], [0, 0, 1, 1], [], []>} : vector<16x16xbf16>, vector<16x8xbf16>, vector<16x8xf32> -> vector<16x8xf32>
    %104 = vector.extract_strided_slice %37 {offsets = [0, 24], sizes = [16, 8], strides = [1, 1]} : vector<16x96xf32> to vector<16x8xf32>
    %105 = vector.extract_strided_slice %37 {offsets = [0, 56], sizes = [16, 8], strides = [1, 1]} : vector<16x96xf32> to vector<16x8xf32>
    %106 = vector.extract_strided_slice %37 {offsets = [0, 88], sizes = [16, 8], strides = [1, 1]} : vector<16x96xf32> to vector<16x8xf32>
    %107 = arith.truncf %104 : vector<16x8xf32> to vector<16x8xbf16>
    %108 = arith.truncf %105 : vector<16x8xf32> to vector<16x8xbf16>
    "tpu.trace_start"() <{level = 10 : i32, message = "qd,kd->qk"}> : () -> ()
    %cst_33 = arith.constant dense<0.000000e+00> : vector<16x16xf32>
    %109 = tpu.matmul %107, %108, %cst_33 {dimension_numbers = #tpu.dot_dimension_numbers<[1], [1], [0], [0], [0, 0, 1, 0], [], []>} : vector<16x8xbf16>, vector<16x8xbf16>, vector<16x16xf32> -> vector<16x16xf32>
    "tpu.trace_stop"() : () -> ()
    %110 = arith.addf %109, %43 : vector<16x16xf32>
    %cst_34 = arith.constant dense<0xFF800000> : vector<16xf32>
    %111 = vector.multi_reduction <maximumf>, %110, %cst_34 [1] : vector<16x16xf32> to vector<16xf32>
    %112 = vector.shape_cast %111 : vector<16xf32> to vector<16x1xf32>
    %113 = vector.broadcast %112 : vector<16x1xf32> to vector<16x16xf32>
    %114 = arith.subf %110, %113 : vector<16x16xf32>
    %115 = math.exp %114 : vector<16x16xf32>
    %cst_35 = arith.constant dense<0.000000e+00> : vector<16xf32>
    %116 = vector.multi_reduction <add>, %115, %cst_35 [1] : vector<16x16xf32> to vector<16xf32>
    %117 = vector.shape_cast %116 : vector<16xf32> to vector<16x1xf32>
    %118 = tpu.reciprocal %117 {approx = true} : vector<16x1xf32> -> vector<16x1xf32>
    %119 = vector.broadcast %118 : vector<16x1xf32> to vector<16x16xf32>
    %120 = arith.mulf %115, %119 : vector<16x16xf32>
    %121 = arith.truncf %120 : vector<16x16xf32> to vector<16x16xbf16>
    %122 = arith.truncf %106 : vector<16x8xf32> to vector<16x8xbf16>
    %cst_36 = arith.constant dense<0.000000e+00> : vector<16x8xf32>
    %123 = tpu.matmul %121, %122, %cst_36 {dimension_numbers = #tpu.dot_dimension_numbers<[1], [0], [0], [1], [0, 0, 1, 1], [], []>} : vector<16x16xbf16>, vector<16x8xbf16>, vector<16x8xf32> -> vector<16x8xf32>
    %124 = tpu.concatenate %63, %83, %103, %123 in 1 : vector<16x8xf32>, vector<16x8xf32>, vector<16x8xf32>, vector<16x8xf32> -> vector<16x32xf32>
    %125 = arith.truncf %124 : vector<16x32xf32> to vector<16x32xbf16>
    %c0_37 = arith.constant 0 : index
    %c0_38 = arith.constant 0 : index
    %c0_39 = arith.constant 0 : index
    %126 = vector.load %arg7[%c0_37, %c0_38, %c0_39] : memref<1x32x32xbf16, #tpu.memory_space<vmem>>, vector<1x32x32xbf16>
    %127 = vector.shape_cast %126 : vector<1x32x32xbf16> to vector<32x32xbf16>
    %cst_40 = arith.constant dense<0.000000e+00> : vector<16x32xf32>
    %128 = tpu.matmul %125, %127, %cst_40 {dimension_numbers = #tpu.dot_dimension_numbers<[1], [0], [0], [1], [0, 0, 1, 1], [], []>} : vector<16x32xbf16>, vector<32x32xbf16>, vector<16x32xf32> -> vector<16x32xf32>
    %c0_41 = arith.constant 0 : index
    %c0_42 = arith.constant 0 : index
    %c0_43 = arith.constant 0 : index
    %129 = vector.load %arg8[%c0_41, %c0_42, %c0_43] : memref<1x1x32xf32, #tpu.memory_space<vmem>>, vector<1x1x32xf32>
    %130 = vector.shape_cast %129 : vector<1x1x32xf32> to vector<1x32xf32>
    %131 = vector.broadcast %130 : vector<1x32xf32> to vector<16x32xf32>
    %132 = arith.addf %128, %131 : vector<16x32xf32>
    %133 = arith.addf %3, %132 : vector<16x32xf32>
    %c0_44 = arith.constant 0 : index
    %c0_45 = arith.constant 0 : index
    %c0_46 = arith.constant 0 : index
    %134 = vector.load %arg9[%c0_44, %c0_45, %c0_46] : memref<1x1x32xf32, #tpu.memory_space<vmem>>, vector<1x1x32xf32>
    %135 = vector.shape_cast %134 : vector<1x1x32xf32> to vector<1x32xf32>
    %c0_47 = arith.constant 0 : index
    %c0_48 = arith.constant 0 : index
    %c0_49 = arith.constant 0 : index
    %136 = vector.load %arg10[%c0_47, %c0_48, %c0_49] : memref<1x1x32xf32, #tpu.memory_space<vmem>>, vector<1x1x32xf32>
    %137 = vector.shape_cast %136 : vector<1x1x32xf32> to vector<1x32xf32>
    %cst_50 = arith.constant dense<0.000000e+00> : vector<16xf32>
    %138 = vector.multi_reduction <add>, %133, %cst_50 [1] : vector<16x32xf32> to vector<16xf32>
    %139 = vector.shape_cast %138 : vector<16xf32> to vector<16x1xf32>
    %cst_51 = arith.constant 3.200000e+01 : f32
    %140 = vector.broadcast %cst_51 : f32 to vector<16x1xf32>
    %141 = arith.divf %139, %140 : vector<16x1xf32>
    %142 = vector.broadcast %141 : vector<16x1xf32> to vector<16x32xf32>
    %143 = arith.subf %133, %142 : vector<16x32xf32>
    %144 = arith.mulf %143, %143 : vector<16x32xf32>
    %cst_52 = arith.constant dense<0.000000e+00> : vector<16xf32>
    %145 = vector.multi_reduction <add>, %144, %cst_52 [1] : vector<16x32xf32> to vector<16xf32>
    %146 = vector.shape_cast %145 : vector<16xf32> to vector<16x1xf32>
    %cst_53 = arith.constant 3.200000e+01 : f32
    %147 = vector.broadcast %cst_53 : f32 to vector<16x1xf32>
    %148 = arith.divf %146, %147 : vector<16x1xf32>
    %149 = vector.broadcast %141 : vector<16x1xf32> to vector<16x32xf32>
    %150 = arith.subf %133, %149 : vector<16x32xf32>
    %cst_54 = arith.constant 9.99999974E-6 : f32
    %151 = vector.broadcast %cst_54 : f32 to vector<16x1xf32>
    %152 = arith.addf %148, %151 : vector<16x1xf32>
    %153 = math.rsqrt %152 : vector<16x1xf32>
    %154 = vector.broadcast %153 : vector<16x1xf32> to vector<16x32xf32>
    %155 = arith.mulf %150, %154 : vector<16x32xf32>
    %156 = vector.broadcast %135 : vector<1x32xf32> to vector<16x32xf32>
    %157 = arith.mulf %155, %156 : vector<16x32xf32>
    %158 = vector.broadcast %137 : vector<1x32xf32> to vector<16x32xf32>
    %159 = arith.addf %157, %158 : vector<16x32xf32>
    %160 = arith.truncf %159 : vector<16x32xf32> to vector<16x32xbf16>
    %c0_55 = arith.constant 0 : index
    %c0_56 = arith.constant 0 : index
    %c0_57 = arith.constant 0 : index
    %161 = vector.load %arg11[%c0_55, %c0_56, %c0_57] : memref<1x32x128xbf16, #tpu.memory_space<vmem>>, vector<1x32x128xbf16>
    %162 = vector.shape_cast %161 : vector<1x32x128xbf16> to vector<32x128xbf16>
    %cst_58 = arith.constant dense<0.000000e+00> : vector<16x128xf32>
    %163 = tpu.matmul %160, %162, %cst_58 {dimension_numbers = #tpu.dot_dimension_numbers<[1], [0], [0], [1], [0, 0, 1, 1], [], []>} : vector<16x32xbf16>, vector<32x128xbf16>, vector<16x128xf32> -> vector<16x128xf32>
    %c0_59 = arith.constant 0 : index
    %c0_60 = arith.constant 0 : index
    %c0_61 = arith.constant 0 : index
    %164 = vector.load %arg12[%c0_59, %c0_60, %c0_61] : memref<1x1x128xf32, #tpu.memory_space<vmem>>, vector<1x1x128xf32>
    %165 = vector.shape_cast %164 : vector<1x1x128xf32> to vector<1x128xf32>
    %166 = vector.broadcast %165 : vector<1x128xf32> to vector<16x128xf32>
    %167 = arith.addf %163, %166 : vector<16x128xf32>
    %cst_62 = arith.constant 5.000000e-01 : f32
    %168 = vector.broadcast %cst_62 : f32 to vector<16x128xf32>
    %169 = arith.mulf %168, %167 : vector<16x128xf32>
    %cst_63 = arith.constant 4.471500e-02 : f32
    %170 = vector.broadcast %cst_63 : f32 to vector<16x128xf32>
    %171 = arith.mulf %170, %167 : vector<16x128xf32>
    %172 = arith.mulf %171, %167 : vector<16x128xf32>
    %173 = arith.mulf %172, %167 : vector<16x128xf32>
    %174 = arith.addf %167, %173 : vector<16x128xf32>
    %cst_64 = arith.constant 0.797884583 : f32
    %175 = vector.broadcast %cst_64 : f32 to vector<16x128xf32>
    %176 = arith.mulf %175, %174 : vector<16x128xf32>
    %177 = math.tanh %176 : vector<16x128xf32>
    %cst_65 = arith.constant 1.000000e+00 : f32
    %178 = vector.broadcast %cst_65 : f32 to vector<16x128xf32>
    %179 = arith.addf %178, %177 : vector<16x128xf32>
    %180 = arith.mulf %169, %179 : vector<16x128xf32>
    %181 = arith.truncf %180 : vector<16x128xf32> to vector<16x128xbf16>
    %c0_66 = arith.constant 0 : index
    %c0_67 = arith.constant 0 : index
    %c0_68 = arith.constant 0 : index
    %182 = vector.load %arg13[%c0_66, %c0_67, %c0_68] : memref<1x128x32xbf16, #tpu.memory_space<vmem>>, vector<1x128x32xbf16>
    %183 = vector.shape_cast %182 : vector<1x128x32xbf16> to vector<128x32xbf16>
    %cst_69 = arith.constant dense<0.000000e+00> : vector<16x32xf32>
    %184 = tpu.matmul %181, %183, %cst_69 {dimension_numbers = #tpu.dot_dimension_numbers<[1], [0], [0], [1], [0, 0, 1, 1], [], []>} : vector<16x128xbf16>, vector<128x32xbf16>, vector<16x32xf32> -> vector<16x32xf32>
    %c0_70 = arith.constant 0 : index
    %c0_71 = arith.constant 0 : index
    %c0_72 = arith.constant 0 : index
    %185 = vector.load %arg14[%c0_70, %c0_71, %c0_72] : memref<1x1x32xf32, #tpu.memory_space<vmem>>, vector<1x1x32xf32>
    %186 = vector.shape_cast %185 : vector<1x1x32xf32> to vector<1x32xf32>
    %187 = vector.broadcast %186 : vector<1x32xf32> to vector<16x32xf32>
    %188 = arith.addf %184, %187 : vector<16x32xf32>
    %189 = arith.addf %133, %188 : vector<16x32xf32>
    %c0_73 = arith.constant 0 : index
    %c0_74 = arith.constant 0 : index
    %190 = vector.load %arg19[%c0_73, %c0_74] : memref<16x32xf32, #tpu.memory_space<vmem>>, vector<16x32xf32>
    tpu.vector_store %arg19[%c0_73, %c0_74], %189 {strides = array<i32>} : memref<16x32xf32, #tpu.memory_space<vmem>>, vector<16x32xf32>,
    %c1_i32 = arith.constant 1 : i32
    %191 = arith.cmpi eq, %arg1, %c1_i32 : i32
    %192 = arith.extui %191 : i1 to i32
    %c0_i32_75 = arith.constant 0 : i32
    %193 = arith.cmpi ne, %192, %c0_i32_75 : i32
    scf.if %193 {
      %c0_76 = arith.constant 0 : index
      %c0_77 = arith.constant 0 : index
      %194 = vector.load %arg15[%c0_76, %c0_77] : memref<1x32xf32, #tpu.memory_space<vmem>>, vector<1x32xf32>
      %c0_78 = arith.constant 0 : index
      %c0_79 = arith.constant 0 : index
      %195 = vector.load %arg16[%c0_78, %c0_79] : memref<1x32xf32, #tpu.memory_space<vmem>>, vector<1x32xf32>
      %cst_80 = arith.constant dense<0.000000e+00> : vector<16xf32>
      %196 = vector.multi_reduction <add>, %189, %cst_80 [1] : vector<16x32xf32> to vector<16xf32>
      %197 = vector.shape_cast %196 : vector<16xf32> to vector<16x1xf32>
      %cst_81 = arith.constant 3.200000e+01 : f32
      %198 = vector.broadcast %cst_81 : f32 to vector<16x1xf32>
      %199 = arith.divf %197, %198 : vector<16x1xf32>
      %200 = vector.broadcast %199 : vector<16x1xf32> to vector<16x32xf32>
      %201 = arith.subf %189, %200 : vector<16x32xf32>
      %202 = arith.mulf %201, %201 : vector<16x32xf32>
      %cst_82 = arith.constant dense<0.000000e+00> : vector<16xf32>
      %203 = vector.multi_reduction <add>, %202, %cst_82 [1] : vector<16x32xf32> to vector<16xf32>
      %204 = vector.shape_cast %203 : vector<16xf32> to vector<16x1xf32>
      %cst_83 = arith.constant 3.200000e+01 : f32
      %205 = vector.broadcast %cst_83 : f32 to vector<16x1xf32>
      %206 = arith.divf %204, %205 : vector<16x1xf32>
      %207 = vector.broadcast %199 : vector<16x1xf32> to vector<16x32xf32>
      %208 = arith.subf %189, %207 : vector<16x32xf32>
      %cst_84 = arith.constant 9.99999974E-6 : f32
      %209 = vector.broadcast %cst_84 : f32 to vector<16x1xf32>
      %210 = arith.addf %206, %209 : vector<16x1xf32>
      %211 = math.rsqrt %210 : vector<16x1xf32>
      %212 = vector.broadcast %211 : vector<16x1xf32> to vector<16x32xf32>
      %213 = arith.mulf %208, %212 : vector<16x32xf32>
      %214 = vector.broadcast %194 : vector<1x32xf32> to vector<16x32xf32>
      %215 = arith.mulf %213, %214 : vector<16x32xf32>
      %216 = vector.broadcast %195 : vector<1x32xf32> to vector<16x32xf32>
      %217 = arith.addf %215, %216 : vector<16x32xf32>
      %218 = arith.truncf %217 : vector<16x32xf32> to vector<16x32xbf16>
      %c0_85 = arith.constant 0 : index
      %c0_86 = arith.constant 0 : index
      %219 = vector.load %arg17[%c0_85, %c0_86] : memref<32x128xbf16, #tpu.memory_space<vmem>>, vector<32x128xbf16>
      %cst_87 = arith.constant dense<0.000000e+00> : vector<16x128xf32>
      %220 = tpu.matmul %218, %219, %cst_87 {dimension_numbers = #tpu.dot_dimension_numbers<[1], [0], [0], [1], [0, 0, 1, 1], [], []>} : vector<16x32xbf16>, vector<32x128xbf16>, vector<16x128xf32> -> vector<16x128xf32>
      %c0_88 = arith.constant 0 : index
      %c0_89 = arith.constant 0 : index
      %221 = vector.load %arg18[%c0_88, %c0_89] : memref<16x128xf32, #tpu.memory_space<vmem>>, vector<16x128xf32>
      tpu.vector_store %arg18[%c0_88, %c0_89], %220 {strides = array<i32>} : memref<16x128xf32, #tpu.memory_space<vmem>>, vector<16x128xf32>,
    } else {
    }
    return
  }
  func.func @transform_0(%arg0: i32, %arg1: i32) -> (i32, i32) {
    %c0_i32 = arith.constant 0 : i32
    %c0_i32_0 = arith.constant 0 : i32
    return %arg0, %c0_i32 : i32, i32
  }
  func.func @transform_1(%arg0: i32, %arg1: i32) -> (i32, i32, i32) {
    %c0_i32 = arith.constant 0 : i32
    %c0_i32_0 = arith.constant 0 : i32
    %c0_i32_1 = arith.constant 0 : i32
    return %arg1, %c0_i32, %c0_i32_0 : i32, i32, i32
  }
  func.func @transform_2(%arg0: i32, %arg1: i32) -> (i32, i32, i32) {
    %c0_i32 = arith.constant 0 : i32
    %c0_i32_0 = arith.constant 0 : i32
    %c0_i32_1 = arith.constant 0 : i32
    return %arg1, %c0_i32, %c0_i32_0 : i32, i32, i32
  }
  func.func @transform_3(%arg0: i32, %arg1: i32) -> (i32, i32, i32) {
    %c0_i32 = arith.constant 0 : i32
    %c0_i32_0 = arith.constant 0 : i32
    %c0_i32_1 = arith.constant 0 : i32
    return %arg1, %c0_i32, %c0_i32_0 : i32, i32, i32
  }
  func.func @transform_4(%arg0: i32, %arg1: i32) -> (i32, i32, i32) {
    %c0_i32 = arith.constant 0 : i32
    %c0_i32_0 = arith.constant 0 : i32
    %c0_i32_1 = arith.constant 0 : i32
    return %arg1, %c0_i32, %c0_i32_0 : i32, i32, i32
  }
  func.func @transform_5(%arg0: i32, %arg1: i32) -> (i32, i32, i32) {
    %c0_i32 = arith.constant 0 : i32
    %c0_i32_0 = arith.constant 0 : i32
    %c0_i32_1 = arith.constant 0 : i32
    return %arg1, %c0_i32, %c0_i32_0 : i32, i32, i32
  }
  func.func @transform_6(%arg0: i32, %arg1: i32) -> (i32, i32, i32) {
    %c0_i32 = arith.constant 0 : i32
    %c0_i32_0 = arith.constant 0 : i32
    %c0_i32_1 = arith.constant 0 : i32
    return %arg1, %c0_i32, %c0_i32_0 : i32, i32, i32
  }
  func.func @transform_7(%arg0: i32, %arg1: i32) -> (i32, i32, i32) {
    %c0_i32 = arith.constant 0 : i32
    %c0_i32_0 = arith.constant 0 : i32
    %c0_i32_1 = arith.constant 0 : i32
    return %arg1, %c0_i32, %c0_i32_0 : i32, i32, i32
  }
  func.func @transform_8(%arg0: i32, %arg1: i32) -> (i32, i32, i32) {
    %c0_i32 = arith.constant 0 : i32
    %c0_i32_0 = arith.constant 0 : i32
    %c0_i32_1 = arith.constant 0 : i32
    return %arg1, %c0_i32, %c0_i32_0 : i32, i32, i32
  }
  func.func @transform_9(%arg0: i32, %arg1: i32) -> (i32, i32, i32) {
    %c0_i32 = arith.constant 0 : i32
    %c0_i32_0 = arith.constant 0 : i32
    %c0_i32_1 = arith.constant 0 : i32
    return %arg1, %c0_i32, %c0_i32_0 : i32, i32, i32
  }
  func.func @transform_10(%arg0: i32, %arg1: i32) -> (i32, i32, i32) {
    %c0_i32 = arith.constant 0 : i32
    %c0_i32_0 = arith.constant 0 : i32
    %c0_i32_1 = arith.constant 0 : i32
    return %arg1, %c0_i32, %c0_i32_0 : i32, i32, i32
  }
  func.func @transform_11(%arg0: i32, %arg1: i32) -> (i32, i32, i32) {
    %c0_i32 = arith.constant 0 : i32
    %c0_i32_0 = arith.constant 0 : i32
    %c0_i32_1 = arith.constant 0 : i32
    return %arg1, %c0_i32, %c0_i32_0 : i32, i32, i32
  }
  func.func @transform_12(%arg0: i32, %arg1: i32) -> (i32, i32, i32) {
    %c0_i32 = arith.constant 0 : i32
    %c0_i32_0 = arith.constant 0 : i32
    %c0_i32_1 = arith.constant 0 : i32
    return %arg1, %c0_i32, %c0_i32_0 : i32, i32, i32
  }
  func.func @transform_13(%arg0: i32, %arg1: i32) -> (i32, i32) {
    %c0_i32 = arith.constant 0 : i32
    %c0_i32_0 = arith.constant 0 : i32
    %c0_i32_1 = arith.constant 0 : i32
    return %c0_i32, %c0_i32_0 : i32, i32
  }
  func.func @transform_14(%arg0: i32, %arg1: i32) -> (i32, i32) {
    %c0_i32 = arith.constant 0 : i32
    %c0_i32_0 = arith.constant 0 : i32
    %c0_i32_1 = arith.constant 0 : i32
    return %c0_i32, %c0_i32_0 : i32, i32
  }
  func.func @transform_15(%arg0: i32, %arg1: i32) -> (i32, i32) {
    %c0_i32 = arith.constant 0 : i32
    %c0_i32_0 = arith.constant 0 : i32
    %c0_i32_1 = arith.constant 0 : i32
    return %c0_i32, %c0_i32_0 : i32, i32
  }
  func.func @transform_16(%arg0: i32, %arg1: i32) -> (i32, i32) {
    %c0_i32 = arith.constant 0 : i32
    %c0_i32_0 = arith.constant 0 : i32
    return %arg0, %c0_i32 : i32, i32
  }
}

</mosaic_0001>

<bundles_post_ra>
// kernel: vqgan_transformer_forward.2
= control target key start
LH: loop header
LB: loop body
LE: loop exit
PB: predicated region body
PF: predicated region fallthrough
CT: control target
= control target key end

     0   :  { %vm37_vm0 = vcmask 392192   ;;  %vm140_vm1 = vcmask 261120   ;;  %vm252_vm2 = vcmask 523264   ;;  %v265_v40 = vlaneseq  ;;  %s510_s1 = inlined_call_operand.vmem [shape: f32[48,32], index: 1, kind: input, shape index: {}]   ;;  %s511_s0 = inlined_call_operand.vmem [shape: f32[32,48], index: 0, kind: input, shape index: {}]   ;;  %s512_s3 = inlined_call_operand.vmem [shape: f32[32,64], index: 3, kind: input, shape index: {}]   ;;  %s513_s2 = inlined_call_operand.vmem [shape: f32[1,32], index: 2, kind: input, shape index: {}]   ;;  %s514_s4 = inlined_call_operand.vmem [shape: f32[1,64], index: 4, kind: input, shape index: {}]   ;;  %s515_s5 = inlined_call_operand.vmem [shape: s32[32,1], index: 5, kind: output, shape index: {}]  }
   0x1   :  { %v29_v0 = vld [vmem:[%s510_s1 + $0x28] sm:$0xff]  ;;  %v28_v1 = vld [vmem:[%s510_s1 + $0x20] sm:$0xff]  ;;  %v27_v2 = vld [vmem:[%s510_s1 + $0x18] sm:$0xff]  ;;  %vm335_vm11 = vcmask 7168  }
   0x2   :  { %372 = vmatprep.subr.mxu0 %v29_v0  ;;  %v20_v3 = vld [vmem:[%s511_s0] sm:$0xff]  ;;  %v139_v4 = vld [vmem:[%s512_s3 + $0x18] sm:$0xff]  ;;  %v26_v5 = vld [vmem:[%s510_s1 + $0x10] sm:$0xff]  ;;  %v266_v41 = vand.u32 127, %v265_v40 }
   0x3   :  { %373 = vmatpush3.msra.mxu0 %v29_v0  ;;  %384 = vmatprep.mubr.msk.f32.mxu0 %vm37_vm0, %v20_v3  ;;  %v25_v6 = vld [vmem:[%s510_s1 + $0x8] sm:$0xff]  ;;  %v24_v7 = vld [vmem:[%s510_s1] sm:$0xff]  ;;  %v22_v9 = vld [vmem:[%s511_s0 + $0x10] sm:$0xff] }
   0x4   :  { %374 = vmatprep.subr.mxu0 %v28_v1  ;;  %390 = vmatprep.subr.mxu1 %v139_v4  ;;  %v21_v8 = vld [vmem:[%s511_s0 + $0x8] sm:$0xff]  ;;  %v23_v10 = vld [vmem:[%s511_s0 + $0x18] sm:$0xff]  ;;  %v138_v11 = vld [vmem:[%s512_s3 + $0x10] sm:$0xff] }
   0x5   :  { %375 = vmatpush3.msra.mxu0 %v28_v1  ;;  %391 = vmatpush3.msra.mxu1 %v139_v4  ;;  %v137_v12 = vld [vmem:[%s512_s3 + $0x8] sm:$0xff]  ;;  %v136_v13 = vld [vmem:[%s512_s3] sm:$0xff] }
   0x6   :  { %376 = vmatprep.subr.mxu0 %v27_v2  ;;  %392 = vmatprep.subr.mxu1 %v138_v11  ;;  %v344_v15 = vld [vmem:[%s513_s2] ss:$0 sm:$0xff] }
   0x7   :  { %377 = vmatpush3.msra.mxu0 %v27_v2  ;;  %393 = vmatpush3.msra.mxu1 %v138_v11  ;;  %v353_v28 = vld [vmem:[%s514_s4] ss:$0 sm:$0xff] }
   0x8   :  { %378 = vmatprep.subr.mxu0 %v26_v5  ;;  %394 = vmatprep.subr.mxu1 %v137_v12 }
   0x9   :  { %379 = vmatpush3.msra.mxu0 %v26_v5  ;;  %395 = vmatpush3.msra.mxu1 %v137_v12 }
   0xa   :  { %380 = vmatprep.subr.mxu0 %v25_v6  ;;  %396 = vmatprep.subr.mxu1 %v136_v13 }
   0xb   :  { %381 = vmatpush3.msra.mxu0 %v25_v6  ;;  %397 = vmatpush3.msra.mxu1 %v136_v13 }
   0xc   :  { %382 = vmatprep.subr.mxu0 %v24_v7 }
   0xd   :  { %383 = vmatpush3.msra.mxu0 %v24_v7 }
   0xe   :  { %385 = vmatmul.mubr.msk.f32.vlgmr.msra.gmra.mxu0 %vm37_vm0, %v21_v8 }
   0xf   :  { %387 = vmatprep.mubr.msk.f32.mxu0 %vm37_vm0, %v22_v9 }
  0x12   :  { %388 = vmatmul.mubr.msk.f32.gmra.mxu0 %vm37_vm0, %v23_v10 }
  0xce   :  { %v386_v14 = vpop.f32.mrf.mxu0 }
  0xcf   :  { %v122_v18 = vadd.f32 %v386_v14, %v344_v15 }
  0xd0   :  { %v116_v16 = vpop.f32.mrf.mxu0 }
  0xd1   :  { %v117_v17 = vadd.f32 %v344_v15, %v116_v16 }
  0xd2   :  { %v389_v19 = vpop.f32.mrf.mxu0 }
  0xd3   :  { %398 = vmatprep.mubr.msk.f32.mxu1 %vm140_vm1, %v117_v17  ;;  %v132_v22 = vadd.f32 %v389_v19, %v344_v15 }
  0xd4   :  { %v126_v20 = vpop.f32.mrf.mxu0  ;;  %399 = vmatmul.mubr.msk.f32.vlgmr.msra.gmra.mxu1 %vm140_vm1, %v122_v18 }
  0xd5   :  { %v127_v21 = vadd.f32 %v344_v15, %v126_v20 }
  0xd7   :  { %401 = vmatprep.mubr.msk.f32.mxu1 %vm140_vm1, %v127_v21 }
  0xd8   :  { %402 = vmatmul.mubr.msk.f32.gmra.mxu1 %vm140_vm1, %v132_v22 }
 0x194   :  { %v400_v23 = vpop.f32.mrf.mxu1 }
 0x195   :  { %v239_v25 = vmul.f32 2.0, %v400_v23 }
 0x196   :  { %v219_v24 = vpop.f32.mrf.mxu1 }
 0x197   :  { %v238_v26 = vmul.f32 2.0, %v219_v24  ;;  %v249_v34 = vsub.f32 %v353_v28, %v239_v25 }
 0x198   :  { %v403_v27 = vpop.f32.mrf.mxu1 }
 0x199   :  { %v248_v29 = vsub.f32 %v353_v28, %v238_v26  ;;  %v241_v31 = vmul.f32 2.0, %v403_v27  ;;  %v256_v36 = vsel %vm252_vm2, %v249_v34, inf }
 0x19a   :  { %v229_v30 = vpop.f32.mrf.mxu1 }
 0x19b   :  { %v240_v32 = vmul.f32 2.0, %v229_v30  ;;  %v253_v33 = vsel %vm252_vm2, %v248_v29, inf  ;;  %v251_v38 = vsub.f32 %v353_v28, %v241_v31 }
 0x19c   :  { %254 = vmin.xlane.f32.xlu0 %v253_v33 }
 0x19d   :  { %v250_v35 = vsub.f32 %v353_v28, %v240_v32  ;;  %v262_v39 = vsel %vm252_vm2, %v251_v38, inf }
 0x19f   :  { %v259_v37 = vsel %vm252_vm2, %v250_v35, inf }
 0x1a0   :  { %257 = vmin.xlane.f32.xlu0 %v256_v36  ;;  %260 = vmin.xlane.f32.xlu1 %v259_v37 }
 0x1a4   :  { %263 = vmin.xlane.f32.xlu1 %v262_v39 }
 0x225   :  { %v255_v42 = vpop.xlane.xlu0 %254 }
 0x226   :  { %vm267_vm3 = vcmp.le.f32.partialorder %v248_v29, %v255_v42 }
 0x227   :  { %v271_v43 = vsel %vm267_vm3, %v266_v41, 64 }
 0x228   :  { %v275_v44 = vsel %vm252_vm2, %v271_v43, 2147483647 }
 0x229   :  { %v258_v45 = vpop.xlane.xlu0 %257  ;;  %v261_v46 = vpop.xlane.xlu1 %260  ;;  %v277_v47 = vshra.s32 %v275_v44, 16  ;;  %v276_v62 = vand.u32 65535, %v275_v44 }
 0x22a   :  { %vm268_vm4 = vcmp.le.f32.partialorder %v249_v34, %v258_v45  ;;  %vm269_vm5 = vcmp.le.f32.partialorder %v250_v35, %v261_v46 }
 0x22b   :  { %v272_v48 = vsel %vm268_vm4, %v266_v41, 64  ;;  %v273_v49 = vsel %vm269_vm5, %v266_v41, 64  ;;  %v279_v50 = vcvt.s32.f32 %v277_v47  ;;  %v278_v0 = vcvt.s32.f32 %v276_v62 }
 0x22c   :  { %v290_v51 = vsel %vm252_vm2, %v272_v48, 2147483647  ;;  %v305_v52 = vsel %vm252_vm2, %v273_v49, 2147483647 }
 0x22d   :  { %280 = vmin.xlane.f32.xlu0 %v279_v50  ;;  %v264_v53 = vpop.xlane.xlu1 %263  ;;  %v292_v54 = vshra.s32 %v290_v51, 16  ;;  %v307_v55 = vshra.s32 %v305_v52, 16  ;;  %v306_v1 = vand.u32 65535, %v305_v52  ;;  %v291_v2 = vand.u32 65535, %v290_v51 }
 0x22e   :  { %vm270_vm6 = vcmp.le.f32.partialorder %v251_v38, %v264_v53 }
 0x22f   :  { %v274_v56 = vsel %vm270_vm6, %v266_v41, 64  ;;  %v294_v57 = vcvt.s32.f32 %v292_v54  ;;  %v309_v58 = vcvt.s32.f32 %v307_v55  ;;  %v308_v6 = vcvt.s32.f32 %v306_v1 }
 0x230   :  { %v320_v59 = vsel %vm252_vm2, %v274_v56, 2147483647  ;;  %v293_v7 = vcvt.s32.f32 %v291_v2 }
 0x231   :  { %295 = vmin.xlane.f32.xlu1 %v294_v57  ;;  %310 = vmin.xlane.f32.xlu0 %v309_v58  ;;  %v322_v60 = vshra.s32 %v320_v59, 16  ;;  %v321_v8 = vand.u32 65535, %v320_v59 }
 0x233   :  { %v324_v61 = vcvt.s32.f32 %v322_v60  ;;  %v323_v12 = vcvt.s32.f32 %v321_v8 }
 0x235   :  { %325 = vmin.xlane.f32.xlu1 %v324_v61 }
 0x2b6   :  { %v281_v63 = vpop.xlane.xlu0 %280 }
 0x2b7   :  { %vm282_vm7 = vcmp.eq.f32.partialorder %v279_v50, %v281_v63  ;;  %v287_v14 = vcvt.f32.s32 %v281_v63 }
 0x2b8   :  { %v283_v3 = vsel %vm282_vm7, %v278_v0, inf }
 0x2b9   :  { %284 = vmin.xlane.f32.xlu0 %v283_v3  ;;  %v288_v17 = vshll.u32 %v287_v14, 16 }
 0x2ba   :  { %v311_v4 = vpop.xlane.xlu0 %310  ;;  %v296_v5 = vpop.xlane.xlu1 %295 }
 0x2bb   :  { %vm312_vm8 = vcmp.eq.f32.partialorder %v309_v58, %v311_v4  ;;  %vm297_vm9 = vcmp.eq.f32.partialorder %v294_v57, %v296_v5  ;;  %v317_v15 = vcvt.f32.s32 %v311_v4  ;;  %v302_v18 = vcvt.f32.s32 %v296_v5 }
 0x2bc   :  { %v313_v9 = vsel %vm312_vm8, %v308_v6, inf  ;;  %v298_v10 = vsel %vm297_vm9, %v293_v7, inf }
 0x2bd   :  { %314 = vmin.xlane.f32.xlu0 %v313_v9  ;;  %299 = vmin.xlane.f32.xlu1 %v298_v10  ;;  %v318_v21 = vshll.u32 %v317_v15, 16  ;;  %v303_v24 = vshll.u32 %v302_v18, 16 }
 0x2be   :  { %v326_v11 = vpop.xlane.xlu1 %325 }
 0x2bf   :  { %vm327_vm10 = vcmp.eq.f32.partialorder %v324_v61, %v326_v11  ;;  %v332_v25 = vcvt.f32.s32 %v326_v11 }
 0x2c0   :  { %v328_v13 = vsel %vm327_vm10, %v323_v12, inf }
 0x2c1   :  { %329 = vmin.xlane.f32.xlu1 %v328_v13  ;;  %v333_v31 = vshll.u32 %v332_v25, 16 }
 0x342   :  { %v285_v16 = vpop.xlane.xlu0 %284 }
 0x343   :  { %v286_v19 = vcvt.f32.s32 %v285_v16 }
 0x345   :  { %v289_v20 = vadd.s32 %v288_v17, %v286_v19 }
 0x346   :  { %v315_v22 = vpop.xlane.xlu0 %314  ;;  %v300_v23 = vpop.xlane.xlu1 %299 }
 0x347   :  { %336 = vst.msk [vmem:[%s515_s5] sm:$0xff] %vm335_vm11, %v289_v20  ;;  %v316_v26 = vcvt.f32.s32 %v315_v22  ;;  %v301_v27 = vcvt.f32.s32 %v300_v23 }
 0x349   :  { %v319_v28 = vadd.s32 %v318_v21, %v316_v26  ;;  %v304_v29 = vadd.s32 %v303_v24, %v301_v27 }
 0x34a   :  { %v330_v30 = vpop.xlane.xlu1 %329 }
 0x34b   :  { %338 = vst.msk [vmem:[%s515_s5 + $0x10] sm:$0xff] %vm335_vm11, %v319_v28  ;;  %337 = vst.msk [vmem:[%s515_s5 + $0x8] sm:$0xff] %vm335_vm11, %v304_v29  ;;  %v331_v32 = vcvt.f32.s32 %v330_v30 }
 0x34d   :  { %v334_v33 = vadd.s32 %v333_v31, %v331_v32 }
 0x34f   :  { %339 = vst.msk [vmem:[%s515_s5 + $0x18] sm:$0xff] %vm335_vm11, %v334_v33 }

// kernel: vqgan_transformer_forward.3
= control target key start
LH: loop header
LB: loop body
LE: loop exit
PB: predicated region body
PF: predicated region fallthrough
CT: control target
= control target key end

     0   :  { %s2991_s0 = inlined_call_operand.vmem [shape: f32[32,32], index: 0, kind: input, shape index: {}]   ;;  %s2992_s1 = inlined_call_operand.vmem [shape: f32[2,1,32], index: 1, kind: input, shape index: {}]   ;;  %s2993_s2 = inlined_call_operand.vmem [shape: f32[2,1,32], index: 2, kind: input, shape index: {}]   ;;  %s2994_s3 = inlined_call_operand.vmem [shape: bf16[2,32,96], index: 3, kind: input, shape index: {}]   ;;  %s2995_s4 = inlined_call_operand.vmem [shape: f32[2,1,96], index: 4, kind: input, shape index: {}]   ;;  %s2996_s5 = inlined_call_operand.vmem [shape: bf16[2,32,32], index: 5, kind: input, shape index: {}]   ;;  %s2997_s6 = inlined_call_operand.vmem [shape: f32[2,1,32], index: 6, kind: input, shape index: {}]   ;;  %s2998_s7 = inlined_call_operand.vmem [shape: f32[2,1,32], index: 7, kind: input, shape index: {}]   ;;  %s2999_s8 = inlined_call_operand.vmem [shape: f32[2,1,32], index: 8, kind: input, shape index: {}]   ;;  %s3000_s9 = inlined_call_operand.vmem [shape: bf16[2,32,128], index: 9, kind: input, shape index: {}]   ;;  %s3001_s10 = inlined_call_operand.vmem [shape: f32[2,1,128], index: 10, kind: input, shape index: {}]   ;;  %s3002_s11 = inlined_call_operand.vmem [shape: bf16[2,128,32], index: 11, kind: input, shape index: {}]   ;;  %s3003_s12 = inlined_call_operand.vmem [shape: f32[2,1,32], index: 12, kind: input, shape index: {}]   ;;  %s3004_s13 = inlined_call_operand.vmem [shape: f32[1,32], index: 13, kind: input, shape index: {}]   ;;  %s3005_s14 = inlined_call_operand.vmem [shape: f32[1,32], index: 14, kind: input, shape index: {}]   ;;  %s3006_s15 = inlined_call_operand.vmem [shape: bf16[32,128], index: 15, kind: input, shape index: {}]   ;;  %s3007_s16 = inlined_call_operand.hbm [shape: f32[32,128], index: 16, kind: output, shape index: {}]  }
   0x1   :  { %3024 = sst [smem:[#allocation19_spill]] %s2991_s0 }
   0x2   :  { %3025 = sst [smem:[#allocation20_spill]] %s2994_s3 }
   0x3   :  { %3026 = sst [smem:[#allocation21_spill]] %s2996_s5 }
   0x4   :  { %3027 = sst [smem:[#allocation22_spill]] %s2998_s7 }
   0x5   :  { %3028 = sst [smem:[#allocation23_spill]] %s3002_s11 }
   0x6   :  { %3029 = sst [smem:[#allocation24_spill]] %s3004_s13 }
   0x7   :  { %3030 = sst [smem:[#allocation25_spill]] %s3005_s14 }
   0x8   :  { %3031 = sst [smem:[#allocation26_spill]] %s3006_s15 }
   0x9   :  { %3032 = sst [smem:[#allocation27_spill]] %s3007_s16 }
   0xa   :  { %21 = vsyncpa [#allocation4], 0 }
   0xb   :  { %23 = vsyncpa [#allocation4 + $0x1], 0  ;;  %s2587_s21 = smov 0   ;;  %s2589_s22 = smov 0  }
   0xc   :  { %s2591_s23 = smov 0   ;;  %s2593_s24 = smov 0  }
   0xd   :  { %s2595_s25 = smov 0   ;;  %s2597_s26 = smov 0  }
   0xe   :  { %s2599_s27 = smov 0   ;;  %s2601_s28 = smov 0  }
   0xf LB: > { %3033 = sst [smem:[#allocation6_spill]] %s2451_s21  ;;  %s2014_s29 = sadd.s32 4294967295, %s2479_s28   ;;  %s2479_s28 = sphi %s2601_s28, %s29_s28   ;;  %s2475_s27 = sphi %s2599_s27, %s3078_s27   ;;  %s2471_s26 = sphi %s2597_s26, %s3077_s26   ;;  %s2467_s25 = sphi %s2595_s25, %s3076_s25   ;;  %s2463_s24 = sphi %s2593_s24, %s3075_s24   ;;  %s2459_s23 = sphi %s2591_s23, %s3074_s23   ;;  %s2455_s22 = sphi %s2589_s22, %s3073_s22   ;;  %s2451_s21 = sphi %s2587_s21, %s3072_s21  }
  0x10   : > { %3034 = sst [smem:[#allocation7_spill]] %s2455_s22  ;;  %s2015_s30 = sadd.s32 4294967294, %s2479_s28  }
  0x11   : > { %3035 = sst [smem:[#allocation8_spill]] %s2459_s23  ;;  %s38_s0 = sadd.s32 1, %s2471_s26 }
  0x12   : > { %3036 = sst [smem:[#allocation9_spill]] %s2463_s24  ;;  %p39_p0 = scmp.ge.s32.totalorder %s38_s0, 2 }
  0x13   : > { %3037 = sst [smem:[#allocation10_spill]] %s2467_s25  ;;  %s41_s17 = sadd.s32 1, %s2475_s27 }
  0x14   : > { %3038 = sst [smem:[#allocation11_spill]] %s2471_s26  ;;  %p459_p1 = scmp.ne.s32.totalorder %s2459_s23, %s2455_s22 }
  0x15   : > { %3039 = sst [smem:[#allocation12_spill]] %s2475_s27  ;;  %p460_p2 = scmp.eq.s32.totalorder %s2014_s29, 3 }
  0x16   : > { %3040 = sst [smem:[#allocation13_spill]] %s2479_s28  ;;  %s3080_s0 = smov (%p39_p0, %s38_s0), 0 }
  0x17   : > { %3041 = sst [smem:[#allocation14_spill]] %s3080_s0  ;;  %s3082_s17 = smov (!%p39_p0, %s41_s17), %s2475_s27 }
  0x18   : > { %p2636_p3 = por %p460_p2, %p459_p1  ;;  %p465_p4 = scmp.ne.s32.totalorder %s2455_s22, %s2451_s21 }
  0x19   : > { %p43_p5 = scmp.ge.s32.totalorder %s3082_s17, 2  ;;  %p466_p6 = scmp.eq.s32.totalorder %s2015_s30, 3 }
  0x1a   : > { %s3042_s18 = scalar_select %p2636_p3, 1, 0 }
  0x1b   : > { %p2018_p7 = scmp.ge.s32.totalorder %s2479_s28, 1  ;;  %p582_p8 = scmp.lt.s32.totalorder %s2479_s28, 5 }
  0x1c   : > { %3043 = sst [smem:[#allocation15_spill]] %s3042_s18  ;;  %s3084_s17 = smov (%p43_p5, %s3082_s17), 0 }
  0x1d   : > { %3044 = sst [smem:[#allocation16_spill]] %s3084_s17  ;;  %p2646_p9 = por %p466_p6, %p465_p4 }
  0x1e   : > { %p583_p10 = pnand %p2018_p7, %p582_p8  ;;  %s446_s20 = ssub.s32 %s2475_s27, %s3084_s17 }
  0x1f   : > { %s3045_s19 = scalar_select %p2646_p9, 1, 0 }
  0x20   : > { %s449_s29 = sadd.s32 1, %s2459_s23  ;;  %p447_p11 = scmp.eq.s32.totalorder %s446_s20, 0 }
  0x21   : > { %3046 = sst [smem:[#allocation17_spill]] %s3045_s19  ;;  %586 = sbr.rel (%p583_p10) target bundleno = 3043 (0xbe3), region = 84 }
  0x22   : > { %s2654_s0 = scalar_select %p447_p11, %s2459_s23, %s449_s29  }
  0x23   : > { %s3013_s30 = sand.u32 (!%p583_p10), 1, %s2455_s22   ;;  %s2020_s26 = sshll.u32 (!%p583_p10), %s2467_s25, 1 }
  0x24   : > { %3047 = sst [smem:[#allocation18_spill]] %s2654_s0  ;;  %s2019_s21 = sshll.u32 (!%p583_p10), %s3013_s30, 4 }
  0x25   : > { %p677_p12 = scmp.lt.s32.totalorder (!%p583_p10), %s2020_s26, 3  ;;  %p682_p13 = scmp.lt.s32.totalorder (!%p583_p10), %s2463_s24, 1 }
  0x26   : > { %s3048_s27 = sld [smem:[#allocation19_spill]]  ;;  %s2721_s13 = scalar_lea.vmem [#allocation3], %s2019_s21 }
  0x27   : > { %s3086_s26 = smov (!%p677_p12, %s2020_s26), 3  ;;  %s3049_s3 = sld [smem:[#allocation20_spill]] }
  0x28   : > { %s2662_s19 = scalar_select %p682_p13, %s2463_s24, 1 }
  0x29   : > { %s2021_s20 = sshll.u32 %s3086_s26, 3  ;;  %s3050_s5 = sld [smem:[#allocation21_spill]] }
  0x2a   : > { %s2075_s25 = sshll.u32 %s2662_s19, 4  ;;  %s709_s28 = scalar_lea.vmem %s2999_s8, %s2662_s19 }
  0x2b   : > { %s2705_s26 = scalar_lea.vmem %s3000_s9, %s2075_s25  ;;  %s717_s11 = scalar_lea.vmem %s3001_s10, %s2662_s19 }
  0x2c   : > { %s680_s30 = scalar_lea.vmem %s3048_s27, %s2021_s20  ;;  %s725_s16 = scalar_lea.vmem %s3003_s12, %s2662_s19 }
  0x2d   : > { %s2679_s15 = scalar_lea.vmem %s3049_s3, %s2075_s25  ;;  %s3052_s22 = sld [smem:[#allocation23_spill]] }
  0x2e   : > { %s3053_s14 = sld [smem:[#allocation9_spill]] }
  0x2f   : > { %s2688_s20 = scalar_lea.vmem %s3050_s5, %s2075_s25  ;;  %s2078_s5 = sshll.u32 %s2662_s19, 6 }
  0x33   : > { %s2719_s7 = scalar_lea.vmem %s3052_s22, %s2078_s5 }
  0x34   : > { %p2030_p0 = scmp.ne.s32.totalorder %s3053_s14, 0 }
  0x36   : > { %731 = sbr.rel (%p2030_p0) target bundleno = 61 (0x3d), region = 88 }
  0x3b   : > { %v732_v0 = vld [vmem:[%s680_s30] sm:$0xff]  ;;  %vm734_vm0 = vcmask 261120   ;;  %v733_v1 = vld [vmem:[%s680_s30 + $0x8] sm:$0xff] }
  0x3c   : > { %735 = vst.msk [vmem:[#allocation2] sm:$0xff] %vm734_vm0, %v732_v0  ;;  %736 = vst.msk [vmem:[#allocation2 + $0x8] sm:$0xff] %vm734_vm0, %v733_v1 }
  0x3d PF: > { %vm741_vm1 = vcmask 261120   ;;  %v2323_v16 = vld [vmem:[%s2679_s15 + $0x8] sm:$0xff]   ;;  %v2481_v17 = vmov 0.0   ;;  %vm2482_vm2 = vmmov 0   ;;  %v2324_v18 = vld [vmem:[%s2679_s15] sm:$0xff]   ;;  %s3054_s15 = scalar_lea.vmem %s2992_s1, %s2662_s19  ;;  %s3055_s25 = scalar_lea.vmem %s2993_s2, %s2662_s19  ;;  %vm866_vm3 = vcmask 64512  }
  0x3e   : > { %2117 = vmatprep.subr.bf16.mxu0 %v2481_v17  ;;  %2121 = vmatprep.mubr.msk.bf16.mxu0 %vm2482_vm2, %v2481_v17  ;;  %v2031_v27 = vld [vmem:[%s3054_s15] ss:$0 sm:$0xff]  ;;  %s3056_s17 = scalar_lea.vmem %s2995_s4, %s2662_s19  ;;  %s2483_s27 = smov 88   ;;  %v853_v55 = vlaneseq  ;;  %v2490_v59 = vmov -1e+30   ;;  %vm914_vm6 = vcmask 130048  }
  0x3f   : > { %2118 = vmatpush3.bf16.msra.mxu0 %v2323_v16  ;;  %2137 = vmatprep.subr.bf16.mxu1 %v2481_v17  ;;  %v2032_v31 = vld [vmem:[%s3055_s25] ss:$0 sm:$0xff]  ;;  %s2484_s23 = smov 96   ;;  %s2485_s0 = smov 120   ;;  %vm1376_vm7 = vcmask 195584  }
  0x40   : > { %2119 = vmatprep.subr.bf16.mxu0 %v2481_v17  ;;  %2139 = vmatprep.mubr.msk.bf16.mxu1 %vm2482_vm2, %v2481_v17  ;;  %v2033_v37 = vld [vmem:[%s3056_s17] ss:$0 sm:$0xff]  ;;  %s2486_s18 = smov 112   ;;  %s2487_s29 = smov 80   ;;  %v854_v56 = vshrl.u32 %v853_v55, 7  ;;  %v857_v57 = vand.u32 127, %v853_v55 }
  0x41   : > { %s2488_s14 = smov 104   ;;  %s2489_s3 = smov 72  }
  0x42   : > { %vm858_vm4 = vcmp.le.s32.totalorder %v857_v57, %v854_v56  ;;  %v855_v58 = vadd.s32 8, %v854_v56  ;;  %s2491_s5 = smov 64   ;;  %s2492_s15 = smov 48  }
  0x43   : > { %v2724_v2 = vld [vmem:[#allocation2] sm:$0xff]  ;;  %v2726_v3 = vld [vmem:[#allocation2 + $0x8] sm:$0xff]  ;;  %2120 = vmatpush3.bf16.msra.mxu0 %v2324_v18  ;;  %v860_v60 = vsel %vm858_vm4, 0.0, %v2490_v59  ;;  %s2493_s21 = smov 40   ;;  %s2494_s22 = smov 56  }
  0x44   : > { %v742_v4 = vsel %vm741_vm1, %v2724_v2, 0.0  ;;  %v745_v5 = vsel %vm741_vm1, %v2726_v3, 0.0  ;;  %2125 = vmatprep.subr.bf16.mxu0 %v2481_v17  ;;  %vm859_vm5 = vcmp.le.s32.totalorder %v857_v57, %v855_v58  ;;  %s2495_s25 = smov 8   ;;  %s2496_s30 = smov 16  }
  0x45   : > { %743 = vadd.xlane.f32.xlu0 %v742_v4  ;;  %v861_v4 = vsel %vm859_vm5, 0.0, %v2490_v59  ;;  %s2497_s24 = smov 24  }
  0x49   : > { %746 = vadd.xlane.f32.xlu0 %v745_v5 }
  0xce   : > { %v744_v6 = vpop.xlane.xlu0 %743 }
  0xcf   : > { %v749_v7 = vmul.f32 0.03125, %v744_v6 }
  0xd1   : > { %v751_v8 = vsub.f32 %v2724_v2, %v749_v7 }
  0xd2   : > { %v747_v9 = vpop.xlane.xlu0 %746 }
  0xd3   : > { %v750_v10 = vmul.f32 0.03125, %v747_v9  ;;  %v753_v11 = vmul.f32 %v751_v8, %v751_v8 }
  0xd5   : > { %v752_v12 = vsub.f32 %v2726_v3, %v750_v10  ;;  %v755_v13 = vsel %vm741_vm1, %v753_v11, 0.0 }
  0xd6   : > { %756 = vadd.xlane.f32.xlu1 %v755_v13 }
  0xd7   : > { %v754_v14 = vmul.f32 %v752_v12, %v752_v12 }
  0xd9   : > { %v758_v15 = vsel %vm741_vm1, %v754_v14, 0.0 }
  0xda   : > { %759 = vadd.xlane.f32.xlu1 %v758_v15 }
 0x15f   : > { %v757_v19 = vpop.xlane.xlu1 %756 }
 0x160   : > { %v761_v20 = vmul.f32 0.03125, %v757_v19 }
 0x162   : > { %v763_v21 = vadd.f32 1e-05, %v761_v20 }
 0x163   : > { %v760_v22 = vpop.xlane.xlu1 %759 }
 0x164   : > { %2337 = vrsqrt.f32 %v763_v21  ;;  %v762_v23 = vmul.f32 0.03125, %v760_v22 }
 0x166   : > { %v764_v24 = vadd.f32 1e-05, %v762_v23 }
 0x168   : > { %2339 = vrsqrt.f32 %v764_v24 }
 0x171   : > { %v2338_v25 = vpop.eup %2337 }
 0x172   : > { %v767_v26 = vmul.f32 %v2338_v25, %v751_v8 }
 0x174   : > { %v775_v30 = vmul.f32 %v2031_v27, %v767_v26 }
 0x175   : > { %v2340_v28 = vpop.eup %2339 }
 0x176   : > { %v768_v29 = vmul.f32 %v2340_v28, %v752_v12  ;;  %v783_v33 = vadd.f32 %v2032_v31, %v775_v30 }
 0x178   : > { %v776_v32 = vmul.f32 %v2031_v27, %v768_v29 }
 0x17a   : > { %v784_v34 = vadd.f32 %v2032_v31, %v776_v32 }
 0x17c   : > { %v785_v35 = vpack.c.bf16 %v784_v34, %v783_v33 }
 0x17e   : > { %2122 = vmatmul.mubr.msk.bf16.vlgmr.msra.gmra.mxu0 %vm741_vm1, %v785_v35 }
 0x17f   : > { %2127 = vmatprep.mubr.msk.bf16.mxu0 %vm2482_vm2, %v2481_v17 }
 0x23e   : > { %v846_v36 = vpop.f32.mrf.mxu0 }
 0x23f   : > { %v847_v40 = vadd.f32 %v2033_v37, %v846_v36 }
 0x240   : > { %v2123_v38 = vpop.f32.mrf.mxu0 }
 0x242   : > { %v849_v39 = vpop.f32.mrf.mxu0 }
 0x243   : > { %v850_v41 = vadd.f32 %v2033_v37, %v849_v39 }
 0x244   : > { %v2124_v42 = vpop.f32.mrf.mxu0 }
 0x245   : > { %v2764_v43 = vpack.c.bf16 %v850_v41, %v847_v40 }
 0x247   : > { %987 = vrot.lane.b32.xlu1 %v2764_v43, %s2483_s27  ;;  %864 = vrot.lane.b32.xlu0 %v2764_v43, %s2484_s23  ;;  %s3057_s27 = scalar_lea.vmem %s2997_s6, %s2662_s19 }
 0x24b   : > { %985 = vrot.lane.b32.xlu1 %v2764_v43, %s2485_s0  ;;  %1106 = vrot.lane.b32.xlu0 %v2764_v43, %s2486_s18  ;;  %s3058_s18 = sld [smem:[#allocation22_spill]] }
 0x24f   : > { %1108 = vrot.lane.b32.xlu1 %v2764_v43, %s2487_s29  ;;  %1227 = vrot.lane.b32.xlu0 %v2764_v43, %s2488_s14 }
 0x253   : > { %1229 = vrot.lane.b32.xlu1 %v2764_v43, %s2489_s3 }
 0x2b9   : > { %v988_v44 = vpop.permute.xlu1 %987  ;;  %v865_v45 = vpop.permute.xlu0 %864 }
 0x2ba   : > { %v871_v46 = vsel %vm866_vm3, %v865_v45, 0  ;;  %v993_v47 = vsel %vm866_vm3, %v988_v44, 0 }
 0x2bb   : > { %2126 = vmatpush3.bf16.xpose.msra.mxu0 %v871_v46  ;;  %2138 = vmatpush3.bf16.xpose.msra.mxu1 %v993_v47 }
 0x2bc   : > { %2149 = vmatprep.subr.bf16.mxu1 %v2481_v17  ;;  %2131 = vmatprep.subr.bf16.mxu0 %v2481_v17 }
 0x2bd   : > { %v986_v48 = vpop.permute.xlu1 %985  ;;  %v1107_v52 = vpop.permute.xlu0 %1106 }
 0x2c1   : > { %v1109_v49 = vpop.permute.xlu1 %1108  ;;  %v1228_v54 = vpop.permute.xlu0 %1227 }
 0x2c2   : > { %v1114_v50 = vsel %vm866_vm3, %v1109_v49, 0  ;;  %2128 = vmatmul.mubr.msk.bf16.vlgmr.msra.gmra.mxu0 %vm866_vm3, %v2764_v43  ;;  %2140 = vmatmul.mubr.msk.bf16.vlgmr.msra.gmra.mxu1 %vm866_vm3, %v986_v48 }
 0x2c3   : > { %2150 = vmatpush3.bf16.xpose.msra.mxu1 %v1114_v50  ;;  %2151 = vmatprep.mubr.msk.bf16.mxu1 %vm2482_vm2, %v2481_v17 }
 0x2c4   : > { %2161 = vmatprep.subr.bf16.mxu1 %v2481_v17  ;;  %2133 = vmatprep.mubr.msk.bf16.mxu0 %vm2482_vm2, %v2481_v17 }
 0x2c5   : > { %v1230_v51 = vpop.permute.xlu1 %1229 }
 0x2c6   : > { %v1235_v53 = vsel %vm866_vm3, %v1230_v51, 0 }
 0x2ca   : > { %2152 = vmatmul.mubr.msk.bf16.vlgmr.msra.gmra.mxu1 %vm866_vm3, %v1107_v52 }
 0x2cb   : > { %2162 = vmatpush3.bf16.xpose.msra.mxu1 %v1235_v53  ;;  %2163 = vmatprep.mubr.msk.bf16.mxu1 %vm2482_vm2, %v2481_v17 }
 0x2cc   : > { %2173 = vmatprep.subr.bf16.mxu1 %v2481_v17 }
 0x2d2   : > { %2164 = vmatmul.mubr.msk.bf16.vlgmr.msra.gmra.mxu1 %vm866_vm3, %v1228_v54 }
 0x2d3   : > { %2177 = vmatprep.mubr.msk.bf16.mxu1 %vm2482_vm2, %v2481_v17 }
 0x382   : > { %v907_v61 = vpop.f32.mrf.mxu0  ;;  %v1029_v62 = vpop.f32.mrf.mxu1 }
 0x383   : > { %v908_v63 = vadd.f32 %v907_v61, %v860_v60  ;;  %v1030_v11 = vadd.f32 %v1029_v62, %v860_v60 }
 0x384   : > { %v2129_v0 = vpop.f32.mrf.mxu0  ;;  %v2141_v1 = vpop.f32.mrf.mxu1 }
 0x385   : > { %v915_v5 = vsel %vm914_vm6, %v908_v63, -inf  ;;  %v1036_v19 = vsel %vm914_vm6, %v1030_v11, -inf }
 0x386   : > { %v1032_v6 = vpop.f32.mrf.mxu1  ;;  %916 = vmax.xlane.f32.xlu1 %v915_v5  ;;  %v910_v7 = vpop.f32.mrf.mxu0 }
 0x387   : > { %v911_v8 = vadd.f32 %v910_v7, %v861_v4  ;;  %v1033_v16 = vadd.f32 %v1032_v6, %v861_v4 }
 0x388   : > { %v2130_v9 = vpop.f32.mrf.mxu0  ;;  %v2142_v10 = vpop.f32.mrf.mxu1 }
 0x389   : > { %v918_v12 = vsel %vm914_vm6, %v911_v8, -inf  ;;  %v1039_v23 = vsel %vm914_vm6, %v1033_v16, -inf }
 0x38a   : > { %v1150_v13 = vpop.f32.mrf.mxu1  ;;  %919 = vmax.xlane.f32.xlu0 %v918_v12 }
 0x38b   : > { %v1151_v14 = vadd.f32 %v1150_v13, %v860_v60 }
 0x38c   : > { %v2153_v15 = vpop.f32.mrf.mxu1 }
 0x38d   : > { %v1157_v18 = vsel %vm914_vm6, %v1151_v14, -inf }
 0x38e   : > { %v1153_v20 = vpop.f32.mrf.mxu1  ;;  %1158 = vmax.xlane.f32.xlu1 %v1157_v18  ;;  %1037 = vmax.xlane.f32.xlu0 %v1036_v19 }
 0x38f   : > { %v1154_v22 = vadd.f32 %v1153_v20, %v861_v4 }
 0x390   : > { %v2154_v21 = vpop.f32.mrf.mxu1 }
 0x391   : > { %v1160_v28 = vsel %vm914_vm6, %v1154_v22, -inf }
 0x392   : > { %v1271_v24 = vpop.f32.mrf.mxu1  ;;  %1040 = vmax.xlane.f32.xlu0 %v1039_v23 }
 0x393   : > { %v1272_v25 = vadd.f32 %v1271_v24, %v860_v60 }
 0x394   : > { %v2165_v26 = vpop.f32.mrf.mxu1 }
 0x395   : > { %v1278_v27 = vsel %vm914_vm6, %v1272_v25, -inf }
 0x396   : > { %v1274_v29 = vpop.f32.mrf.mxu1  ;;  %1279 = vmax.xlane.f32.xlu1 %v1278_v27  ;;  %1161 = vmax.xlane.f32.xlu0 %v1160_v28 }
 0x397   : > { %v1275_v30 = vadd.f32 %v1274_v29, %v861_v4 }
 0x398   : > { %v2166_v31 = vpop.f32.mrf.mxu1 }
 0x399   : > { %v1281_v32 = vsel %vm914_vm6, %v1275_v30, -inf }
 0x39a   : > { %1282 = vmax.xlane.f32.xlu0 %v1281_v32 }
 0x3a7   : > { %938 = vrot.lane.b32.xlu1 %v2764_v43, %s2491_s5  ;;  %s3060_s5 = sld [smem:[#allocation9_spill]] }
 0x3ad   : > { %p2064_p1 = scmp.ne.s32.totalorder %s3060_s5, 1 }
 0x3ae   : > { %s3063_s23 = sld [smem:[#allocation25_spill]] (!%p2064_p1) }
 0x40f   : > { %v917_v33 = vpop.xlane.xlu1 %916 }
 0x410   : > { %v921_v34 = vsub.f32 %v908_v63, %v917_v33 }
 0x412   : > { %v923_v35 = vmul.f32 1.442695, %v921_v34 }
 0x413   : > { %v920_v36 = vpop.xlane.xlu0 %919 }
 0x414   : > { %2341 = vpow2.f32 %v923_v35  ;;  %v922_v37 = vsub.f32 %v911_v8, %v920_v36 }
 0x416   : > { %v925_v38 = vmul.f32 1.442695, %v922_v37 }
 0x417   : > { %v1159_v39 = vpop.xlane.xlu1 %1158  ;;  %v1038_v40 = vpop.xlane.xlu0 %1037 }
 0x418   : > { %2343 = vpow2.f32 %v925_v38  ;;  %v1163_v41 = vsub.f32 %v1151_v14, %v1159_v39  ;;  %v1042_v42 = vsub.f32 %v1030_v11, %v1038_v40 }
 0x41a   : > { %v1044_v44 = vmul.f32 1.442695, %v1042_v42  ;;  %v1165_v45 = vmul.f32 1.442695, %v1163_v41 }
 0x41b   : > { %v1041_v46 = vpop.xlane.xlu0 %1040 }
 0x41c   : > { %v1043_v47 = vsub.f32 %v1033_v16, %v1041_v46  ;;  %2345 = vpow2.f32 %v1044_v44 }
 0x41d   : > { %2347 = vpow2.f32 %v1165_v45 }
 0x41e   : > { %v1046_v48 = vmul.f32 1.442695, %v1043_v47 }
 0x41f   : > { %v1280_v49 = vpop.xlane.xlu1 %1279  ;;  %v1162_v50 = vpop.xlane.xlu0 %1161 }
 0x420   : > { %2349 = vpow2.f32 %v1046_v48  ;;  %v1284_v51 = vsub.f32 %v1272_v25, %v1280_v49  ;;  %v1164_v52 = vsub.f32 %v1154_v22, %v1162_v50 }
 0x421   : > { %v2342_v53 = vpop.eup %2341 }
 0x422   : > { %v1286_v54 = vmul.f32 1.442695, %v1284_v51  ;;  %v1167_v55 = vmul.f32 1.442695, %v1164_v52  ;;  %v927_v56 = vsel %vm914_vm6, %v2342_v53, 0.0  ;;  %v2325_v52 = vld [vmem:[%s2688_s20 + $0x8] sm:$0xff]  }
 0x423   : > { %928 = vadd.xlane.f32.xlu1 %v927_v56  ;;  %v939_v57 = vpop.permute.xlu1 %938  ;;  %v1283_v58 = vpop.xlane.xlu0 %1282  ;;  %2174 = vmatpush3.bf16.msra.mxu1 %v2325_v52 }
 0x424   : > { %2351 = vpow2.f32 %v1286_v54  ;;  %v1285_v59 = vsub.f32 %v1275_v30, %v1283_v58  ;;  %2132 = vmatpush3.bf16.msra.mxu0 %v939_v57  ;;  %2175 = vmatprep.subr.bf16.mxu1 %v2481_v17  ;;  %v2326_v58 = vld [vmem:[%s2688_s20] sm:$0xff]   ;;  %s3062_s20 = sld [smem:[#allocation24_spill]] (!%p2064_p1) }
 0x425   : > { %v2344_v60 = vpop.eup %2343  ;;  %2353 = vpow2.f32 %v1167_v55  ;;  %2143 = vmatprep.subr.bf16.mxu0 %v2481_v17 }
 0x426   : > { %v1288_v61 = vmul.f32 1.442695, %v1285_v59  ;;  %v930_v62 = vsel %vm914_vm6, %v2344_v60, 0.0 }
 0x427   : > { %931 = vadd.xlane.f32.xlu0 %v930_v62  ;;  %2176 = vmatpush3.bf16.msra.mxu1 %v2326_v58 }
 0x428   : > { %2355 = vpow2.f32 %v1288_v61  ;;  %2189 = vmatprep.subr.bf16.mxu1 %v2481_v17 }
 0x429   : > { %v2346_v63 = vpop.eup %2345 }
 0x42a   : > { %v1048_v0 = vsel %vm914_vm6, %v2346_v63, 0.0  ;;  %v2348_v1 = vpop.eup %2347 }
 0x42b   : > { %1049 = vadd.xlane.f32.xlu1 %v1048_v0  ;;  %v1169_v6 = vsel %vm914_vm6, %v2348_v1, 0.0 }
 0x42d   : > { %v2350_v4 = vpop.eup %2349 }
 0x42e   : > { %v1051_v5 = vsel %vm914_vm6, %v2350_v4, 0.0 }
 0x42f   : > { %1052 = vadd.xlane.f32.xlu0 %v1051_v5  ;;  %1170 = vadd.xlane.f32.xlu1 %v1169_v6 }
 0x431   : > { %v2809_v7 = vpop.eup %2351 }
 0x432   : > { %v2354_v8 = vpop.eup %2353  ;;  %v1290_v9 = vsel %vm914_vm6, %v2809_v7, 0.0 }
 0x433   : > { %v1172_v10 = vsel %vm914_vm6, %v2354_v8, 0.0  ;;  %1291 = vadd.xlane.f32.xlu1 %v1290_v9 }
 0x434   : > { %1173 = vadd.xlane.f32.xlu0 %v1172_v10 }
 0x435   : > { %v2356_v11 = vpop.eup %2355 }
 0x436   : > { %v1293_v12 = vsel %vm914_vm6, %v2356_v11, 0.0 }
 0x438   : > { %1294 = vadd.xlane.f32.xlu0 %v1293_v12 }
 0x444   : > { %1180 = vrot.lane.b32.xlu1 %v2764_v43, %s2492_s15  ;;  %s3061_s15 = sld [smem:[#allocation26_spill]] (!%p2064_p1) }
 0x448   : > { %1301 = vrot.lane.b32.xlu1 %v2764_v43, %s2493_s21 }
 0x44e   : > { %1059 = vrot.lane.b32.xlu0 %v2764_v43, %s2494_s22 }
 0x4ac   : > { %v929_v13 = vpop.xlane.xlu1 %928 }
 0x4ad   : > { %2357 = vrcp.f32 %v929_v13 }
 0x4b0   : > { %v932_v14 = vpop.xlane.xlu0 %931 }
 0x4b1   : > { %2359 = vrcp.f32 %v932_v14 }
 0x4b4   : > { %v1050_v15 = vpop.xlane.xlu1 %1049 }
 0x4b5   : > { %2361 = vrcp.f32 %v1050_v15 }
 0x4b8   : > { %v1053_v16 = vpop.xlane.xlu0 %1052  ;;  %v1171_v18 = vpop.xlane.xlu1 %1170 }
 0x4b9   : > { %2363 = vrcp.f32 %v1053_v16 }
 0x4ba   : > { %v2358_v19 = vpop.eup %2357  ;;  %2365 = vrcp.f32 %v1171_v18 }
 0x4bb   : > { %v935_v22 = vmul.f32 %v2358_v19, %v2342_v53 }
 0x4bc   : > { %v1292_v26 = vpop.xlane.xlu1 %1291 }
 0x4bd   : > { %v1174_v20 = vpop.xlane.xlu0 %1173 }
 0x4be   : > { %v2360_v21 = vpop.eup %2359  ;;  %2367 = vrcp.f32 %v1174_v20 }
 0x4bf   : > { %v936_v23 = vmul.f32 %v2360_v21, %v2344_v60  ;;  %v2045_v21 = vld [vmem:[%s3057_s27] ss:$0 sm:$0xff] }
 0x4c0   : > { %v1181_v33 = vpop.permute.xlu1 %1180 }
 0x4c1   : > { %v1295_v24 = vpop.xlane.xlu0 %1294  ;;  %v937_v25 = vpack.c.bf16 %v936_v23, %v935_v22 }
 0x4c2   : > { %v2362_v43 = vpop.eup %2361  ;;  %2369 = vrcp.f32 %v1295_v24 }
 0x4c3   : > { %2134 = vmatmul.mubr.msk.bf16.vlgmr.msra.gmra.mxu0 %vm914_vm6, %v937_v25  ;;  %2371 = vrcp.f32 %v1292_v26  ;;  %v1056_v29 = vmul.f32 %v2362_v43, %v2346_v63 }
 0x4c4   : > { %2145 = vmatprep.mubr.msk.bf16.mxu0 %vm2482_vm2, %v2481_v17  ;;  %v1302_v39 = vpop.permute.xlu1 %1301 }
 0x4c5   : > { %v1060_v27 = vpop.permute.xlu0 %1059 }
 0x4c6   : > { %v2364_v28 = vpop.eup %2363  ;;  %2144 = vmatpush3.bf16.msra.mxu0 %v1060_v27 }
 0x4c7   : > { %2155 = vmatprep.subr.bf16.mxu0 %v2481_v17  ;;  %v1057_v30 = vmul.f32 %v2364_v28, %v2350_v4  ;;  %v2366_v32 = vpop.eup %2365 }
 0x4c8   : > { %v1177_v36 = vmul.f32 %v2366_v32, %v2348_v1 }
 0x4c9   : > { %v1058_v31 = vpack.c.bf16 %v1057_v30, %v1056_v29 }
 0x4cb   : > { %2146 = vmatmul.mubr.msk.bf16.vlgmr.msra.gmra.mxu0 %vm914_vm6, %v1058_v31  ;;  %v2368_v34 = vpop.eup %2367 }
 0x4cc   : > { %2156 = vmatpush3.bf16.msra.mxu0 %v1181_v33  ;;  %2157 = vmatprep.mubr.msk.bf16.mxu0 %vm2482_vm2, %v2481_v17  ;;  %v1178_v35 = vmul.f32 %v2368_v34, %v2354_v8 }
 0x4cd   : > { %2167 = vmatprep.subr.bf16.mxu0 %v2481_v17 }
 0x4ce   : > { %v1179_v37 = vpack.c.bf16 %v1178_v35, %v1177_v36 }
 0x4cf   : > { %v2370_v38 = vpop.eup %2369 }
 0x4d0   : > { %v2372_v40 = vpop.eup %2371  ;;  %v1299_v41 = vmul.f32 %v2370_v38, %v2356_v11 }
 0x4d1   : > { %v1298_v42 = vmul.f32 %v2372_v40, %v2809_v7  ;;  %v2328_v40 = vld [vmem:[%s2705_s26] sm:$0xff]  }
 0x4d3   : > { %2158 = vmatmul.mubr.msk.bf16.vlgmr.msra.gmra.mxu0 %vm914_vm6, %v1179_v37  ;;  %v1300_v44 = vpack.c.bf16 %v1299_v41, %v1298_v42 }
 0x4d4   : > { %2168 = vmatpush3.bf16.msra.mxu0 %v1302_v39  ;;  %2169 = vmatprep.mubr.msk.bf16.mxu0 %vm2482_vm2, %v2481_v17  ;;  %v2327_v39 = vld [vmem:[%s2705_s26 + $0x8] sm:$0xff]   ;;  %s3059_s26 = scalar_lea.vmem %s3058_s18, %s2662_s19 }
 0x4d5   : > { %2181 = vmatprep.subr.bf16.mxu0 %v2481_v17 }
 0x4db   : > { %2170 = vmatmul.mubr.msk.bf16.vlgmr.msra.gmra.mxu0 %vm914_vm6, %v1300_v44 }
 0x4dc   : > { %2185 = vmatprep.mubr.msk.bf16.mxu0 %vm2482_vm2, %v2481_v17  ;;  %2182 = vmatpush3.bf16.msra.mxu0 %v2327_v39 }
 0x4dd   : > { %2183 = vmatprep.subr.bf16.mxu0 %v2481_v17 }
 0x4e0   : > { %2184 = vmatpush3.bf16.msra.mxu0 %v2328_v40 }
 0x583   : > { %v978_v45 = vpop.f32.mrf.mxu0 }
 0x585   : > { %v2135_v46 = vpop.f32.mrf.mxu0 }
 0x587   : > { %v981_v47 = vpop.f32.mrf.mxu0 }
 0x589   : > { %v2136_v48 = vpop.f32.mrf.mxu0 }
 0x58b   : > { %v1099_v49 = vpop.f32.mrf.mxu0 }
 0x58d   : > { %v2147_v50 = vpop.f32.mrf.mxu0 }
 0x58e   : > { %v2049_v50 = vld [vmem:[%s3059_s26] ss:$0 sm:$0xff] }
 0x58f   : > { %v1102_v51 = vpop.f32.mrf.mxu0 }
 0x590   : > { %v2308_v53 = vpack.i.bf16 %v1102_v51, %v1099_v49 }
 0x591   : > { %v2148_v54 = vpop.f32.mrf.mxu0 }
 0x592   : > { %2309 = vrot.lane.b32.xlu1 %v2308_v53, %s2495_s25  ;;  %v2050_v54 = vld [vmem:[%s709_s28] ss:$0 sm:$0xff] }
 0x593   : > { %v1220_v55 = vpop.f32.mrf.mxu0 }
 0x595   : > { %v2159_v56 = vpop.f32.mrf.mxu0 }
 0x597   : > { %v1223_v57 = vpop.f32.mrf.mxu0 }
 0x598   : > { %v2313_v59 = vpack.i.bf16 %v1223_v57, %v1220_v55 }
 0x599   : > { %v2160_v60 = vpop.f32.mrf.mxu0 }
 0x59a   : > { %2314 = vrot.lane.b32.xlu0 %v2313_v59, %s2496_s30  ;;  %v2329_v59 = vld [vmem:[%s2719_s7 + $0x38] sm:$0xff]   ;;  %v2330_v60 = vld [vmem:[%s2719_s7 + $0x30] sm:$0xff]  }
 0x59b   : > { %v1341_v61 = vpop.f32.mrf.mxu0 }
 0x59d   : > { %v2171_v62 = vpop.f32.mrf.mxu0 }
 0x59e   : > { %v2332_v62 = vld [vmem:[%s2719_s7 + $0x20] sm:$0xff]  }
 0x59f   : > { %v1344_v63 = vpop.f32.mrf.mxu0 }
 0x5a0   : > { %v2318_v0 = vpack.i.bf16 %v1344_v63, %v1341_v61  ;;  %v2331_v61 = vld [vmem:[%s2719_s7 + $0x28] sm:$0xff]   ;;  %v2333_v63 = vld [vmem:[%s2719_s7 + $0x18] sm:$0xff]  }
 0x5a1   : > { %v2172_v1 = vpop.f32.mrf.mxu0 }
 0x5a2   : > { %2319 = vrot.lane.b32.xlu1 %v2318_v0, %s2497_s24  ;;  %v2334_v0 = vld [vmem:[%s2719_s7 + $0x10] sm:$0xff]   ;;  %v2335_v1 = vld [vmem:[%s2719_s7 + $0x8] sm:$0xff]  }
 0x604   : > { %v2310_v4 = vpop.permute.xlu1 %2309 }
 0x605   : > { %v2312_v6 = vunpack.i.h.bf16 %v2310_v4  ;;  %v2311_v7 = vunpack.i.l.bf16 %v2310_v4  ;;  %v2336_v4 = vld [vmem:[%s2719_s7] sm:$0xff]  }
 0x607   : > { %v1373_v11 = vsel %vm866_vm3, %v981_v47, %v2312_v6  ;;  %v1372_v12 = vsel %vm866_vm3, %v978_v45, %v2311_v7 }
 0x60c   : > { %v2315_v5 = vpop.permute.xlu0 %2314 }
 0x60d   : > { %v2317_v8 = vunpack.i.h.bf16 %v2315_v5  ;;  %v2316_v9 = vunpack.i.l.bf16 %v2315_v5  ;;  %v2051_v5 = vld [vmem:[%s717_s11] ss:$0 sm:$0xff] }
 0x60f   : > { %v1375_v15 = vsel %vm914_vm6, %v1373_v11, %v2317_v8  ;;  %v1374_v16 = vsel %vm914_vm6, %v1372_v12, %v2316_v9 }
 0x614   : > { %v2320_v10 = vpop.permute.xlu1 %2319 }
 0x615   : > { %v2322_v13 = vunpack.i.h.bf16 %v2320_v10  ;;  %v2321_v14 = vunpack.i.l.bf16 %v2320_v10 }
 0x617   : > { %v1378_v18 = vsel %vm1376_vm7, %v1375_v15, %v2322_v13  ;;  %v1377_v19 = vsel %vm1376_vm7, %v1374_v16, %v2321_v14 }
 0x618   : > { %v1379_v20 = vpack.c.bf16 %v1378_v18, %v1377_v19 }
 0x61a   : > { %2178 = vmatmul.mubr.msk.bf16.vlgmr.msra.gmra.mxu1 %vm741_vm1, %v1379_v20 }
 0x61b   : > { %2205 = vmatprep.mubr.msk.bf16.mxu1 %vm2482_vm2, %v2481_v17  ;;  %2190 = vmatpush3.bf16.msra.mxu1 %v2329_v59 }
 0x61c   : > { %2191 = vmatprep.subr.bf16.mxu1 %v2481_v17 }
 0x61f   : > { %2192 = vmatpush3.bf16.msra.mxu1 %v2330_v60 }
 0x620   : > { %2193 = vmatprep.subr.bf16.mxu1 %v2481_v17 }
 0x623   : > { %2194 = vmatpush3.bf16.msra.mxu1 %v2331_v61 }
 0x624   : > { %2195 = vmatprep.subr.bf16.mxu1 %v2481_v17 }
 0x627   : > { %2196 = vmatpush3.bf16.msra.mxu1 %v2332_v62 }
 0x628   : > { %2197 = vmatprep.subr.bf16.mxu1 %v2481_v17 }
 0x62b   : > { %2198 = vmatpush3.bf16.msra.mxu1 %v2333_v63 }
 0x62c   : > { %2199 = vmatprep.subr.bf16.mxu1 %v2481_v17 }
 0x62f   : > { %2200 = vmatpush3.bf16.msra.mxu1 %v2334_v0 }
 0x630   : > { %2201 = vmatprep.subr.bf16.mxu1 %v2481_v17 }
 0x633   : > { %2202 = vmatpush3.bf16.msra.mxu1 %v2335_v1 }
 0x634   : > { %2203 = vmatprep.subr.bf16.mxu1 %v2481_v17 }
 0x637   : > { %2204 = vmatpush3.bf16.msra.mxu1 %v2336_v4 }
 0x6da   : > { %v1440_v22 = vpop.f32.mrf.mxu1 }
 0x6db   : > { %v1441_v23 = vadd.f32 %v2045_v21, %v1440_v22 }
 0x6dc   : > { %v2179_v24 = vpop.f32.mrf.mxu1 }
 0x6dd   : > { %v2852_v25 = vadd.f32 %v1441_v23, %v2724_v2 }
 0x6de   : > { %v1443_v43 = vpop.f32.mrf.mxu1 }
 0x6df   : > { %v1444_v26 = vadd.f32 %v2045_v21, %v1443_v43  ;;  %v1451_v27 = vsel %vm741_vm1, %v2852_v25, 0.0 }
 0x6e0   : > { %1452 = vadd.xlane.f32.xlu0 %v1451_v27  ;;  %v2180_v28 = vpop.f32.mrf.mxu1 }
 0x6e1   : > { %v2857_v29 = vadd.f32 %v1444_v26, %v2726_v3 }
 0x6e3   : > { %v1454_v30 = vsel %vm741_vm1, %v2857_v29, 0.0 }
 0x6e4   : > { %1455 = vadd.xlane.f32.xlu1 %v1454_v30 }
 0x769   : > { %v1453_v31 = vpop.xlane.xlu0 %1452 }
 0x76a   : > { %v1457_v32 = vmul.f32 0.03125, %v1453_v31 }
 0x76c   : > { %v1459_v2 = vsub.f32 %v2852_v25, %v1457_v32  ;;  %v2055_v32 = vld [vmem:[%s725_s16] ss:$0 sm:$0xff] }
 0x76d   : > { %v1456_v33 = vpop.xlane.xlu1 %1455 }
 0x76e   : > { %v1458_v34 = vmul.f32 0.03125, %v1456_v33  ;;  %v1461_v35 = vmul.f32 %v1459_v2, %v1459_v2 }
 0x770   : > { %v1460_v36 = vsub.f32 %v2857_v29, %v1458_v34  ;;  %v1463_v37 = vsel %vm741_vm1, %v1461_v35, 0.0 }
 0x771   : > { %1464 = vadd.xlane.f32.xlu0 %v1463_v37 }
 0x772   : > { %v1462_v38 = vmul.f32 %v1460_v36, %v1460_v36 }
 0x774   : > { %v1466_v3 = vsel %vm741_vm1, %v1462_v38, 0.0 }
 0x775   : > { %1467 = vadd.xlane.f32.xlu0 %v1466_v3 }
 0x7fa   : > { %v1465_v41 = vpop.xlane.xlu0 %1464 }
 0x7fb   : > { %v1469_v42 = vmul.f32 0.03125, %v1465_v41 }
 0x7fd   : > { %v1471_v44 = vadd.f32 1e-05, %v1469_v42 }
 0x7fe   : > { %v1468_v45 = vpop.xlane.xlu0 %1467 }
 0x7ff   : > { %2373 = vrsqrt.f32 %v1471_v44  ;;  %v1470_v46 = vmul.f32 0.03125, %v1468_v45 }
 0x801   : > { %v1472_v47 = vadd.f32 1e-05, %v1470_v46 }
 0x803   : > { %2375 = vrsqrt.f32 %v1472_v47 }
 0x80c   : > { %v2374_v48 = vpop.eup %2373 }
 0x80d   : > { %v1475_v49 = vmul.f32 %v2374_v48, %v1459_v2 }
 0x80f   : > { %v1483_v53 = vmul.f32 %v2049_v50, %v1475_v49 }
 0x810   : > { %v2376_v51 = vpop.eup %2375 }
 0x811   : > { %v1476_v52 = vmul.f32 %v2376_v51, %v1460_v36  ;;  %v1491_v56 = vadd.f32 %v2050_v54, %v1483_v53 }
 0x813   : > { %v1484_v55 = vmul.f32 %v2049_v50, %v1476_v52 }
 0x815   : > { %v1492_v57 = vadd.f32 %v2050_v54, %v1484_v55 }
 0x817   : > { %v1493_v58 = vpack.c.bf16 %v1492_v57, %v1491_v56 }
 0x819   : > { %2186 = vmatmul.mubr.msk.bf16.vlgmr.msra.gmra.mxu0 %vm741_vm1, %v1493_v58 }
 0x8d9   : > { %v1554_v6 = vpop.f32.mrf.mxu0 }
 0x8da   : > { %v1555_v7 = vadd.f32 %v2051_v5, %v1554_v6 }
 0x8db   : > { %v2187_v8 = vpop.f32.mrf.mxu0 }
 0x8dc   : > { %v1563_v9 = vmul.f32 0.044715, %v1555_v7  ;;  %v1561_v43 = vmul.f32 0.5, %v1555_v7 }
 0x8dd   : > { %v1557_v10 = vpop.f32.mrf.mxu0 }
 0x8de   : > { %v1565_v11 = vmul.f32 %v1563_v9, %v1555_v7  ;;  %v1558_v12 = vadd.f32 %v2051_v5, %v1557_v10 }
 0x8df   : > { %v2188_v13 = vpop.f32.mrf.mxu0 }
 0x8e0   : > { %v1567_v14 = vmul.f32 %v1565_v11, %v1555_v7  ;;  %v1564_v15 = vmul.f32 0.044715, %v1558_v12  ;;  %v1562_v26 = vmul.f32 0.5, %v1558_v12 }
 0x8e2   : > { %v1569_v16 = vadd.f32 %v1567_v14, %v1555_v7  ;;  %v1566_v18 = vmul.f32 %v1564_v15, %v1558_v12 }
 0x8e4   : > { %v1571_v19 = vmul.f32 0.7978846, %v1569_v16  ;;  %v1568_v17 = vmul.f32 %v1566_v18, %v1558_v12 }
 0x8e6   : > { %2377 = vtanh.f32 %v1571_v19  ;;  %v1570_v20 = vadd.f32 %v1568_v17, %v1558_v12 }
 0x8e8   : > { %v1572_v21 = vmul.f32 0.7978846, %v1570_v20 }
 0x8ea   : > { %2379 = vtanh.f32 %v1572_v21 }
 0x8f3   : > { %v2378_v22 = vpop.eup %2377 }
 0x8f4   : > { %v1575_v23 = vadd.f32 1.0, %v2378_v22 }
 0x8f6   : > { %v1577_v28 = vmul.f32 %v1575_v23, %v1561_v43 }
 0x8f7   : > { %v2380_v24 = vpop.eup %2379 }
 0x8f8   : > { %v1576_v27 = vadd.f32 1.0, %v2380_v24 }
 0x8fa   : > { %v1578_v30 = vmul.f32 %v1576_v27, %v1562_v26 }
 0x8fc   : > { %v1579_v31 = vpack.c.bf16 %v1578_v30, %v1577_v28 }
 0x8fe   : > { %2206 = vmatmul.mubr.bf16.vlgmr.msra.gmra.mxu1 %v1579_v31 }
 0x9be   : > { %v1685_v2 = vpop.f32.mrf.mxu1 }
 0x9bf   : > { %v1686_v33 = vadd.f32 %v2055_v32, %v1685_v2 }
 0x9c0   : > { %v2207_v34 = vpop.f32.mrf.mxu1 }
 0x9c1   : > { %v1692_v35 = vadd.f32 %v1686_v33, %v2852_v25 }
 0x9c2   : > { %v1688_v36 = vpop.f32.mrf.mxu1 }
 0x9c3   : > { %1694 = vst.msk [vmem:[#allocation2] sm:$0xff] %vm741_vm1, %v1692_v35  ;;  %v1689_v37 = vadd.f32 %v2055_v32, %v1688_v36  ;;  %1699 = sbr.rel (%p2064_p1) target bundleno = 3017 (0xbc9), region = 92 }
 0x9c4   : > { %v2208_v38 = vpop.f32.mrf.mxu1 }
 0x9c5   : > { %v1693_v3 = vadd.f32 %v1689_v37, %v2857_v29 }
 0x9c7   : > { %1695 = vst.msk [vmem:[#allocation2 + $0x8] sm:$0xff] %vm741_vm1, %v1693_v3 }
 0x9c8   : > { %v1702_v39 = vsel %vm741_vm1, %v1692_v35, 0.0  ;;  %v1705_v40 = vsel %vm741_vm1, %v1693_v3, 0.0  ;;  %v2381_v50 = vld [vmem:[%s3061_s15 + $0x8] sm:$0xff]   ;;  %v2498_v51 = vmov 0.0   ;;  %vm2499_vm8 = vmmov 0   ;;  %v2382_v52 = vld [vmem:[%s3061_s15] sm:$0xff]  }
 0x9c9   : > { %1703 = vadd.xlane.f32.xlu0 %v1702_v39  ;;  %2209 = vmatprep.subr.bf16.mxu0 %v2498_v51  ;;  %v2065_v61 = vld [vmem:[%s3062_s20] ss:$0 sm:$0xff] }
 0x9ca   : > { %2213 = vmatprep.mubr.msk.bf16.mxu0 %vm2499_vm8, %v2498_v51  ;;  %2210 = vmatpush3.bf16.msra.mxu0 %v2381_v50  ;;  %v2066_v1 = vld [vmem:[%s3063_s23] ss:$0 sm:$0xff] }
 0x9cb   : > { %2211 = vmatprep.subr.bf16.mxu0 %v2498_v51 }
 0x9cd   : > { %1706 = vadd.xlane.f32.xlu0 %v1705_v40 }
 0x9ce   : > { %2212 = vmatpush3.bf16.msra.mxu0 %v2382_v52 }
 0xa52   : > { %v1704_v41 = vpop.xlane.xlu0 %1703 }
 0xa53   : > { %v1708_v25 = vmul.f32 0.03125, %v1704_v41 }
 0xa55   : > { %v1710_v42 = vsub.f32 %v1692_v35, %v1708_v25 }
 0xa56   : > { %v1707_v44 = vpop.xlane.xlu0 %1706 }
 0xa57   : > { %v1709_v45 = vmul.f32 0.03125, %v1707_v44  ;;  %v1712_v46 = vmul.f32 %v1710_v42, %v1710_v42 }
 0xa59   : > { %v1711_v47 = vsub.f32 %v1693_v3, %v1709_v45  ;;  %v1714_v29 = vsel %vm741_vm1, %v1712_v46, 0.0 }
 0xa5a   : > { %1715 = vadd.xlane.f32.xlu1 %v1714_v29 }
 0xa5b   : > { %v1713_v48 = vmul.f32 %v1711_v47, %v1711_v47 }
 0xa5d   : > { %v1717_v49 = vsel %vm741_vm1, %v1713_v48, 0.0 }
 0xa5e   : > { %1718 = vadd.xlane.f32.xlu1 %v1717_v49 }
 0xae3   : > { %v1716_v53 = vpop.xlane.xlu1 %1715 }
 0xae4   : > { %v1720_v54 = vmul.f32 0.03125, %v1716_v53 }
 0xae6   : > { %v1722_v55 = vadd.f32 1e-05, %v1720_v54 }
 0xae7   : > { %v1719_v56 = vpop.xlane.xlu1 %1718 }
 0xae8   : > { %2383 = vrsqrt.f32 %v1722_v55  ;;  %v1721_v57 = vmul.f32 0.03125, %v1719_v56 }
 0xaea   : > { %v1723_v58 = vadd.f32 1e-05, %v1721_v57 }
 0xaec   : > { %2385 = vrsqrt.f32 %v1723_v58 }
 0xaf5   : > { %v2384_v59 = vpop.eup %2383 }
 0xaf6   : > { %v1726_v60 = vmul.f32 %v2384_v59, %v1710_v42 }
 0xaf8   : > { %v1734_v0 = vmul.f32 %v2065_v61, %v1726_v60 }
 0xaf9   : > { %v2386_v62 = vpop.eup %2385 }
 0xafa   : > { %v1727_v63 = vmul.f32 %v2386_v62, %v1711_v47  ;;  %v1742_v5 = vadd.f32 %v2066_v1, %v1734_v0 }
 0xafc   : > { %v1735_v4 = vmul.f32 %v2065_v61, %v1727_v63 }
 0xafe   : > { %v1743_v6 = vadd.f32 %v2066_v1, %v1735_v4 }
 0xb00   : > { %v1744_v7 = vpack.c.bf16 %v1743_v6, %v1742_v5 }
 0xb02   : > { %2214 = vmatmul.mubr.msk.bf16.vlgmr.msra.gmra.mxu0 %vm741_vm1, %v1744_v7 }
 0xbc2   : > { %v1798_v8 = vpop.f32.mrf.mxu0 }
 0xbc3   : > { %1805 = vst [vmem:[%s2721_s13] sm:$0xff] %v1798_v8 }
 0xbc4   : > { %v2215_v9 = vpop.f32.mrf.mxu0 }
 0xbc6   : > { %v1801_v10 = vpop.f32.mrf.mxu0 }
 0xbc7   : > { %1806 = vst [vmem:[%s2721_s13 + $0x8] sm:$0xff] %v1801_v10 }
 0xbc8   : > { %v2216_v11 = vpop.f32.mrf.mxu0 }
 0xbc9 PF: > { %s3064_s0 = sld [smem:[#allocation10_spill]]  ;;  %s1821_s11 = sshll.u32 %s2721_s13, 4  ;;  %s2935_s11 = int_to_ptr.vmem [resolvable:$true] %s1821_s11 }
 0xbca   : > { %s3065_s18 = sld [smem:[#allocation7_spill]]  ;;  %s2387_s16 = scalar_lea.vmem %s2935_s11, 256 }
 0xbcb   : > { %s3067_s3 = sld [smem:[#allocation27_spill]]  ;;  %p2388_p2 = scmp.ne.s32.totalorder %s2935_s11, %s2387_s16 }
 0xbcc   : > { %s2500_s21 = smov [#allocation3]  }
 0xbcd   : > { %p2389_p4 = pnand %p2388_p2, %p2636_p3  ;;  %s2391_s22 = sshll.u32 %s2500_s21, 4  ;;  %s2392_s22 = int_to_ptr.vmem [resolvable:$false] %s2391_s22 }
 0xbce   : > { %s2393_s30 = scalar_lea.vmem %s2392_s22, 512  ;;  %p2394_p6 = scmp.lt.s32.totalorder %s2935_s11, %s2392_s22 }
 0xbcf   : > { %s2079_s29 = sshll.u32 %s3064_s0, 8  ;;  %p2390_p5 = pneg %p2389_p4 }
 0xbd0   : > { %s3068_s5 = sand.u32 1, %s3065_s18   ;;  %p2395_p7 = scmp.lt.s32.totalorder %s2393_s30, %s2387_s16 }
 0xbd1   : > { %s2932_s7 = scalar_lea.hbm %s3067_s3, %s2079_s29  ;;  %s2939_s19 = scalar_lea.sflag [#allocation4], %s3068_s5 }
 0xbd2   : > { %p2396_p8 = por %p2395_p7, %p2394_p6 }
 0xbd4   : > { %p2397_p10 = pnand %p2396_p8, %p2390_p5 }
 0xbd6   : > { %2400 = shalt.err (!%p2397_p10)
}
 0xbd7   : > { %s2401_s13 = scalar_lea.hbm %s2932_s7, 256  ;;  %s2405_s17 = scalar_lea.hbm %s3067_s3, 512 }
 0xbd8   : > { %p2402_p11 = scmp.ne.s32.totalorder %s2932_s7, %s2401_s13  ;;  %p2406_p0 = scmp.lt.s32.totalorder %s2932_s7, %s3067_s3 }
 0xbd9   : > { %p2407_p1 = scmp.lt.s32.totalorder %s2405_s17, %s2401_s13 }
 0xbda   : > { %p2403_p12 = pnand %p2402_p11, %p2636_p3 }
 0xbdb   : > { %p2408_p2 = por %p2407_p1, %p2406_p0 }
 0xbdc   : > { %p2404_p13 = pneg %p2403_p12 }
 0xbde   : > { %p2409_p4 = pnand %p2408_p2, %p2404_p13 }
 0xbe0   : > { %2412 = shalt.err (!%p2409_p4)
}
 0xbe1   : > { %s2501_s0 = smov 128  }
 0xbe2   : > { %2217 = dma.vmem_to_hbm [thread:$0]  (%p2636_p3), %s2935_s11, 256, %s2932_s7, %s2939_s19, %s2501_s0, %s2501_s0, %s2495_s25  }
 0xbe3 PF: > { %s3069_s18 = sld [smem:[#allocation13_spill]] }
 0xbe4   : > { %s3070_s29 = sld [smem:[#allocation6_spill]] }
 0xbe9   : > { %p2223_p5 = scmp.ge.s32.totalorder %s3069_s18, 2 }
 0xbea   : > { %s1836_s28 = sand.u32 1, %s3070_s29  }
 0xbeb   : > { %p2220_p6 = pnand %p2223_p5, %p2646_p9  ;;  %s1837_s5 = scalar_lea.sflag [#allocation4], %s1836_s28 }
 0xbed   : > { %p2221_p7 = pneg %p2220_p6 }
 0xbef   : > { %2446 = dma.done.wait (%p2221_p7), %s1837_s5, 256  }
 0xbf0   : > { %2448 = vsyncadd (%p2221_p7), %s1837_s5, 4294967040  ;;  %s29_s28 = sadd.s32 1, %s3069_s18   ;;  %s3072_s21 = sld [smem:[#allocation7_spill]] }
 0xbf1   : > { %p26_p8 = scmp.ge.s32.totalorder %s29_s28, 6   ;;  %s3073_s22 = sld [smem:[#allocation8_spill]] }
 0xbf2   : > { %s3074_s23 = sld [smem:[#allocation18_spill]] }
 0xbf3   : > { %s3075_s24 = sld [smem:[#allocation11_spill]]  ;;  %28 = sbr.rel (!%p26_p8) target bundleno = 15 (0xf), region = 163 }
 0xbf4   : > { %s3076_s25 = sld [smem:[#allocation12_spill]] }
 0xbf5   : > { %s3077_s26 = sld [smem:[#allocation14_spill]] }
 0xbf6   : > { %s3078_s27 = sld [smem:[#allocation16_spill]] }
 0xbf8   :  { %1842 = vsyncpa [#allocation4], 1 }
 0xbf9   :  { %1844 = vsyncpa [#allocation4 + $0x1], 1 }

</bundles_post_ra>
